<compile_context>
chip_gen: v7x
topology: tpu7x:2x2x1
jax: 0.10.0
libtpu: 0.0.40
codegen_flags: <defaults>
</compile_context>

<pallas_src>
import functools

import jax
import jax.numpy as jnp
from jax.experimental import pallas as pl
from jax.experimental.pallas import tpu as pltpu


# ---------------------------------------------------------------------------
# VMEM sizing helpers ((8,128)-layout aware, generation aware)
# ---------------------------------------------------------------------------

def _round_up(v, m):
    return (v + m - 1) // m * m


def _sublane(itemsize):
    return {4: 8, 2: 16, 1: 32}.get(itemsize, 8)


def _tile_bytes(rows, cols, itemsize):
    """Bytes one (rows, cols) slab occupies in VMEM after (sublane,128) tiling."""
    return (_round_up(max(int(rows), 1), _sublane(itemsize))
            * _round_up(max(int(cols), 1), 128) * itemsize)


def _vmem_limit_bytes():
    """Scoped-VMEM limit to request: ~3/4 of the chip's per-core VMEM, capped."""
    try:
        cap = int(pltpu.get_tpu_info().vmem_capacity_bytes)
    except Exception:
        cap = 64 << 20          # v7x-safe fallback (smallest VMEM of the targets)
    return int(max(32 << 20, min(cap * 3 // 4, 96 << 20)))


def _choose_block(num_frames, n, f, e, in_itemsize, w_itemsize, out_itemsize,
                  n_weights):
    """Pick frames-per-grid-step Bt and the scoped VMEM limit to request."""
    vmem_limit = _vmem_limit_bytes()
    budget = vmem_limit // 2    # headroom for compiler-internal scratch

    # Pipelined (double-buffered) per-frame operands.
    per_frame = 2 * (_tile_bytes(n, n, in_itemsize)
                     + _tile_bytes(n, f, in_itemsize)
                     + _tile_bytes(n, e, out_itemsize))
    # f32 in-kernel intermediates (a@x, a@(a@x), weight-matmul result, f32 'a').
    per_frame += (3 * _tile_bytes(n, f, 4) + _tile_bytes(n, e, 4)
                  + _tile_bytes(n, n, 4))

    # Grid-invariant weights are still double-buffered by the default BlockSpec.
    weight_bytes = 2 * n_weights * _tile_bytes(max(f, e), e, w_itemsize)

    bt = max(1, (budget - weight_bytes) // max(per_frame, 1))

    # Keep >= 4 grid steps (>= 2 per TensorCore on v7x) so the pipeline overlaps
    # DMA with compute and both cores get work.
    if num_frames >= 4:
        bt = min(bt, max(1, pl.cdiv(num_frames, 4)))
    bt = int(min(bt, num_frames))

    # Nudge Bt so the flattened weight-matmul M = Bt*N lands on a sublane
    # multiple (period of (bt*n) % 8 in bt divides 8, so a window of 8 suffices).
    if bt > 1 and (bt * n) % 8:
        for cand in range(bt, max(bt - 8, 0), -1):
            if (cand * n) % 8 == 0:
                bt = cand
                break

    return int(max(bt, 1)), vmem_limit


# ---------------------------------------------------------------------------
# Kernel bodies
# ---------------------------------------------------------------------------

def _adj_contract(a, x):
    """Per-frame adjacency contraction: (Bt,N,N) @ (Bt,N,F) -> (Bt,N,F) in f32.

    For tiny N the MXU would run at <1% utilization, so we sweep the contraction
    on the VPU with an unrolled FMA chain (lane-parallel over F); larger N keeps
    the batched MXU matmul.
    """
    n = a.shape[-1]
    if n <= 32:
        a32 = a.astype(jnp.float32)
        x32 = x.astype(jnp.float32)
        acc = a32[:, :, 0:1] * x32[:, 0:1, :]
        for j in range(1, n):
            acc = acc + a32[:, :, j:j + 1] * x32[:, j:j + 1, :]
        return acc
    return jnp.einsum('bij,bjf->bif', a, x, preferred_element_type=jnp.float32)


def _weight_matmul(h, w):
    """Flattened (Bt*N, F) @ (F, E) MXU matmul with f32 accumulation."""
    bt, n, f = h.shape
    e = w.shape[-1]
    out = jnp.dot(h.reshape(bt * n, f).astype(w.dtype), w,
                  preferred_element_type=jnp.float32)
    return out.reshape(bt, n, e)


def _gcn_kernel_fused(a_ref, x_ref, wc_ref, o_ref, *, compute_dtype):
    """out = (a @ (a @ x)) @ Wc with Wc = W1 @ W2 (valid: no bias, no activation)."""
    a = a_ref[...].astype(compute_dtype)
    x = x_ref[...].astype(compute_dtype)
    wc = wc_ref[...]
    f = x.shape[-1]
    e = wc.shape[-1]

    if f <= e:
        h = _adj_contract(a, x).astype(compute_dtype)     # a @ x        (Bt,N,F)
        h = _adj_contract(a, h).astype(compute_dtype)     # a @ (a @ x)  (Bt,N,F)
        out = _weight_matmul(h, wc)                       # @ Wc         (Bt,N,E)
    else:
        h = _adj_contract(a, x).astype(compute_dtype)     # a @ x        (Bt,N,F)
        hw = _weight_matmul(h, wc).astype(compute_dtype)  # @ Wc         (Bt,N,E)
        out = _adj_contract(a, hw)                        # a @ (..)     (Bt,N,E)

    o_ref[...] = out.astype(o_ref.dtype)


def _graph_conv_layer(a, x, w, compute_dtype):
    """One GraphConvolution layer (a @ x) @ w, association picked from shapes."""
    f = x.shape[-1]
    e = w.shape[-1]
    if f <= e:
        ax = _adj_contract(a, x).astype(compute_dtype)
        return _weight_matmul(ax, w)
    xw = _weight_matmul(x, w).astype(compute_dtype)
    return _adj_contract(a, xw)


def _gcn_kernel_unfused(a_ref, x_ref, w1_ref, w2_ref, o_ref, *, compute_dtype):
    """Layer-by-layer path (kept behind fuse_weights=False)."""
    a = a_ref[...].astype(compute_dtype)
    h = x_ref[...].astype(compute_dtype)
    h = _graph_conv_layer(a, h, w1_ref[...], compute_dtype).astype(compute_dtype)
    h = _graph_conv_layer(a, h, w2_ref[...], compute_dtype)
    o_ref[...] = h.astype(o_ref.dtype)


# ---------------------------------------------------------------------------
# Wrapper
# ---------------------------------------------------------------------------

def gcn_forward(input_seq, adj_seq, w1, w2, *, compute_dtype=None,
                fuse_weights=True):
    """Pallas implementation of GCN.forward (two bias-free GraphConvolution layers).

    input_seq: (B, T, N, feature_dim)
    adj_seq:   (B, T, N, N)
    w1:        (feature_dim, embed_dim)
    w2:        (embed_dim, embed_dim)
    compute_dtype: optional (e.g. jnp.bfloat16); the cast happens *inside* the
        kernel so HBM traffic for the big operands is unchanged.  MXU/VPU
        accumulation stays f32.  Default: input dtype (f32 -> exact).
    fuse_weights: fold W1 @ W2 into one weight matmul (exact while the GCN stays
        linear: no bias, no activation in forward).
    returns:   (B, T, N, embed_dim), dtype of input_seq.
    """
    B, T, N, F = input_seq.shape
    assert adj_seq.shape == (B, T, N, N)
    E = w1.shape[1]
    assert w1.shape == (F, E) and w2.shape == (E, E)

    dtype = (jnp.dtype(compute_dtype) if compute_dtype is not None
             else jnp.dtype(input_seq.dtype))
    out_dtype = input_seq.dtype

    # Flatten (B, T) into one independent frame axis (free metadata reshape).
    BT = B * T
    x = input_seq.reshape(BT, N, F)
    a = adj_seq.reshape(BT, N, N)

    if fuse_weights:
        wc = jnp.dot(w1.astype(jnp.float32), w2.astype(jnp.float32),
                     preferred_element_type=jnp.float32).astype(dtype)
        weights = (wc,)
        kernel = functools.partial(_gcn_kernel_fused, compute_dtype=dtype)
    else:
        weights = (w1.astype(dtype), w2.astype(dtype))
        kernel = functools.partial(_gcn_kernel_unfused, compute_dtype=dtype)

    Bt, vmem_limit = _choose_block(
        BT, N, F, E,
        in_itemsize=jnp.dtype(input_seq.dtype).itemsize,
        w_itemsize=jnp.dtype(dtype).itemsize,
        out_itemsize=jnp.dtype(out_dtype).itemsize,
        n_weights=len(weights))
    steps = int(pl.cdiv(BT, Bt))   # partial last block handled by Pallas masking

    in_specs = [
        pl.BlockSpec((Bt, N, N), lambda i: (i, 0, 0)),   # adjacency frame block
        pl.BlockSpec((Bt, N, F), lambda i: (i, 0, 0)),   # feature frame block
    ] + [pl.BlockSpec(w.shape, lambda i: (0, 0)) for w in weights]

    grid_spec = pltpu.PrefetchScalarGridSpec(
        num_scalar_prefetch=0,
        grid=(steps,),
        in_specs=in_specs,
        out_specs=pl.BlockSpec((Bt, N, E), lambda i: (i, 0, 0)),
    )

    out = pl.pallas_call(
        kernel,
        out_shape=jax.ShapeDtypeStruct((BT, N, E), out_dtype),
        grid_spec=grid_spec,
        compiler_params=pltpu.CompilerParams(
            dimension_semantics=("parallel",),
            vmem_limit_bytes=vmem_limit,
        ),
    )(a, x, *weights)

    return out.reshape(B, T, N, E)


# ---------------------------------------------------------------------------
# Self-test
# ---------------------------------------------------------------------------

if __name__ == "__main__":
    # Small shapes consistent with the module: batch=2, seq_len=4, N=16 nodes,
    # feature_dim=32, embed_dim=64.
    B, T, N, FEAT, EMBED = 2, 4, 16, 32, 64

    key = jax.random.PRNGKey(0)
    kx, ka, k1, k2 = jax.random.split(key, 4)

    input_seq = jax.random.normal(kx, (B, T, N, FEAT), dtype=jnp.float32)
    adj_seq = jax.random.normal(ka, (B, T, N, N), dtype=jnp.float32)

    # Parameter init mirroring __init__: weight = torch.randn(...); no bias.
    w1 = jax.random.normal(k1, (FEAT, EMBED), dtype=jnp.float32)
    w2 = jax.random.normal(k2, (EMBED, EMBED), dtype=jnp.float32)

    # Pure-JAX reference for GCN.forward (two bias-free GraphConvolution layers).
    h = jnp.matmul(jnp.matmul(adj_seq, input_seq), w1)
    ref = jnp.matmul(jnp.matmul(adj_seq, h), w2)

    out_fused = jax.block_until_ready(
        gcn_forward(input_seq, adj_seq, w1, w2, fuse_weights=True))
    out_unfused = jax.block_until_ready(
        gcn_forward(input_seq, adj_seq, w1, w2, fuse_weights=False))

    assert out_fused.shape == (B, T, N, EMBED)
    assert out_unfused.shape == (B, T, N, EMBED)
    assert jnp.allclose(out_fused, ref, rtol=1e-3, atol=1e-1), "fused mismatch"
    assert jnp.allclose(out_unfused, ref, rtol=1e-3, atol=1e-1), "unfused mismatch"

    print("KERNEL_OK")
</pallas_src>

<mosaic_0001>
module attributes {stable_mosaic.version = 11 : i64} {
  func.func @_gcn_kernel_fused(%arg0: i32, %arg1: memref<2x16x16xf32, #tpu.memory_space<vmem>>, %arg2: memref<2x16x32xf32, #tpu.memory_space<vmem>>, %arg3: memref<32x64xf32, #tpu.memory_space<vmem>>, %arg4: memref<2x16x64xf32, #tpu.memory_space<vmem>>) attributes {dimension_semantics = [#tpu.dimension_semantics<parallel>], iteration_bounds = array<i64: 4>, scalar_prefetch = 0 : i64, scratch_operands = 0 : i64, tpu.core_type = #tpu.core_type<tc>, window_params = [{transform_indices = @transform_0, window_bounds = array<i64: 2, 16, 16>}, {transform_indices = @transform_1, window_bounds = array<i64: 2, 16, 32>}, {pipeline_mode = #tpu.pipeline_mode<synchronous>, transform_indices = @transform_2, window_bounds = array<i64: 32, 64>}, {transform_indices = @transform_3, window_bounds = array<i64: 2, 16, 64>}]} {
    %c0 = arith.constant 0 : index
    %c0_0 = arith.constant 0 : index
    %c0_1 = arith.constant 0 : index
    %0 = vector.load %arg1[%c0, %c0_0, %c0_1] : memref<2x16x16xf32, #tpu.memory_space<vmem>>, vector<2x16x16xf32>
    %c0_2 = arith.constant 0 : index
    %c0_3 = arith.constant 0 : index
    %c0_4 = arith.constant 0 : index
    %1 = vector.load %arg2[%c0_2, %c0_3, %c0_4] : memref<2x16x32xf32, #tpu.memory_space<vmem>>, vector<2x16x32xf32>
    %c0_5 = arith.constant 0 : index
    %c0_6 = arith.constant 0 : index
    %2 = vector.load %arg3[%c0_5, %c0_6] : memref<32x64xf32, #tpu.memory_space<vmem>>, vector<32x64xf32>
    %3 = vector.extract_strided_slice %0 {offsets = [0, 0, 0], sizes = [2, 16, 1], strides = [1, 1, 1]} : vector<2x16x16xf32> to vector<2x16x1xf32>
    %4 = vector.extract_strided_slice %1 {offsets = [0, 0, 0], sizes = [2, 1, 32], strides = [1, 1, 1]} : vector<2x16x32xf32> to vector<2x1x32xf32>
    %5 = vector.broadcast %3 : vector<2x16x1xf32> to vector<2x16x32xf32>
    %6 = vector.broadcast %4 : vector<2x1x32xf32> to vector<2x16x32xf32>
    %7 = arith.mulf %5, %6 : vector<2x16x32xf32>
    %8 = vector.extract_strided_slice %0 {offsets = [0, 0, 1], sizes = [2, 16, 1], strides = [1, 1, 1]} : vector<2x16x16xf32> to vector<2x16x1xf32>
    %9 = vector.extract_strided_slice %1 {offsets = [0, 1, 0], sizes = [2, 1, 32], strides = [1, 1, 1]} : vector<2x16x32xf32> to vector<2x1x32xf32>
    %10 = vector.broadcast %8 : vector<2x16x1xf32> to vector<2x16x32xf32>
    %11 = vector.broadcast %9 : vector<2x1x32xf32> to vector<2x16x32xf32>
    %12 = arith.mulf %10, %11 : vector<2x16x32xf32>
    %13 = arith.addf %7, %12 : vector<2x16x32xf32>
    %14 = vector.extract_strided_slice %0 {offsets = [0, 0, 2], sizes = [2, 16, 1], strides = [1, 1, 1]} : vector<2x16x16xf32> to vector<2x16x1xf32>
    %15 = vector.extract_strided_slice %1 {offsets = [0, 2, 0], sizes = [2, 1, 32], strides = [1, 1, 1]} : vector<2x16x32xf32> to vector<2x1x32xf32>
    %16 = vector.broadcast %14 : vector<2x16x1xf32> to vector<2x16x32xf32>
    %17 = vector.broadcast %15 : vector<2x1x32xf32> to vector<2x16x32xf32>
    %18 = arith.mulf %16, %17 : vector<2x16x32xf32>
    %19 = arith.addf %13, %18 : vector<2x16x32xf32>
    %20 = vector.extract_strided_slice %0 {offsets = [0, 0, 3], sizes = [2, 16, 1], strides = [1, 1, 1]} : vector<2x16x16xf32> to vector<2x16x1xf32>
    %21 = vector.extract_strided_slice %1 {offsets = [0, 3, 0], sizes = [2, 1, 32], strides = [1, 1, 1]} : vector<2x16x32xf32> to vector<2x1x32xf32>
    %22 = vector.broadcast %20 : vector<2x16x1xf32> to vector<2x16x32xf32>
    %23 = vector.broadcast %21 : vector<2x1x32xf32> to vector<2x16x32xf32>
    %24 = arith.mulf %22, %23 : vector<2x16x32xf32>
    %25 = arith.addf %19, %24 : vector<2x16x32xf32>
    %26 = vector.extract_strided_slice %0 {offsets = [0, 0, 4], sizes = [2, 16, 1], strides = [1, 1, 1]} : vector<2x16x16xf32> to vector<2x16x1xf32>
    %27 = vector.extract_strided_slice %1 {offsets = [0, 4, 0], sizes = [2, 1, 32], strides = [1, 1, 1]} : vector<2x16x32xf32> to vector<2x1x32xf32>
    %28 = vector.broadcast %26 : vector<2x16x1xf32> to vector<2x16x32xf32>
    %29 = vector.broadcast %27 : vector<2x1x32xf32> to vector<2x16x32xf32>
    %30 = arith.mulf %28, %29 : vector<2x16x32xf32>
    %31 = arith.addf %25, %30 : vector<2x16x32xf32>
    %32 = vector.extract_strided_slice %0 {offsets = [0, 0, 5], sizes = [2, 16, 1], strides = [1, 1, 1]} : vector<2x16x16xf32> to vector<2x16x1xf32>
    %33 = vector.extract_strided_slice %1 {offsets = [0, 5, 0], sizes = [2, 1, 32], strides = [1, 1, 1]} : vector<2x16x32xf32> to vector<2x1x32xf32>
    %34 = vector.broadcast %32 : vector<2x16x1xf32> to vector<2x16x32xf32>
    %35 = vector.broadcast %33 : vector<2x1x32xf32> to vector<2x16x32xf32>
    %36 = arith.mulf %34, %35 : vector<2x16x32xf32>
    %37 = arith.addf %31, %36 : vector<2x16x32xf32>
    %38 = vector.extract_strided_slice %0 {offsets = [0, 0, 6], sizes = [2, 16, 1], strides = [1, 1, 1]} : vector<2x16x16xf32> to vector<2x16x1xf32>
    %39 = vector.extract_strided_slice %1 {offsets = [0, 6, 0], sizes = [2, 1, 32], strides = [1, 1, 1]} : vector<2x16x32xf32> to vector<2x1x32xf32>
    %40 = vector.broadcast %38 : vector<2x16x1xf32> to vector<2x16x32xf32>
    %41 = vector.broadcast %39 : vector<2x1x32xf32> to vector<2x16x32xf32>
    %42 = arith.mulf %40, %41 : vector<2x16x32xf32>
    %43 = arith.addf %37, %42 : vector<2x16x32xf32>
    %44 = vector.extract_strided_slice %0 {offsets = [0, 0, 7], sizes = [2, 16, 1], strides = [1, 1, 1]} : vector<2x16x16xf32> to vector<2x16x1xf32>
    %45 = vector.extract_strided_slice %1 {offsets = [0, 7, 0], sizes = [2, 1, 32], strides = [1, 1, 1]} : vector<2x16x32xf32> to vector<2x1x32xf32>
    %46 = vector.broadcast %44 : vector<2x16x1xf32> to vector<2x16x32xf32>
    %47 = vector.broadcast %45 : vector<2x1x32xf32> to vector<2x16x32xf32>
    %48 = arith.mulf %46, %47 : vector<2x16x32xf32>
    %49 = arith.addf %43, %48 : vector<2x16x32xf32>
    %50 = vector.extract_strided_slice %0 {offsets = [0, 0, 8], sizes = [2, 16, 1], strides = [1, 1, 1]} : vector<2x16x16xf32> to vector<2x16x1xf32>
    %51 = vector.extract_strided_slice %1 {offsets = [0, 8, 0], sizes = [2, 1, 32], strides = [1, 1, 1]} : vector<2x16x32xf32> to vector<2x1x32xf32>
    %52 = vector.broadcast %50 : vector<2x16x1xf32> to vector<2x16x32xf32>
    %53 = vector.broadcast %51 : vector<2x1x32xf32> to vector<2x16x32xf32>
    %54 = arith.mulf %52, %53 : vector<2x16x32xf32>
    %55 = arith.addf %49, %54 : vector<2x16x32xf32>
    %56 = vector.extract_strided_slice %0 {offsets = [0, 0, 9], sizes = [2, 16, 1], strides = [1, 1, 1]} : vector<2x16x16xf32> to vector<2x16x1xf32>
    %57 = vector.extract_strided_slice %1 {offsets = [0, 9, 0], sizes = [2, 1, 32], strides = [1, 1, 1]} : vector<2x16x32xf32> to vector<2x1x32xf32>
    %58 = vector.broadcast %56 : vector<2x16x1xf32> to vector<2x16x32xf32>
    %59 = vector.broadcast %57 : vector<2x1x32xf32> to vector<2x16x32xf32>
    %60 = arith.mulf %58, %59 : vector<2x16x32xf32>
    %61 = arith.addf %55, %60 : vector<2x16x32xf32>
    %62 = vector.extract_strided_slice %0 {offsets = [0, 0, 10], sizes = [2, 16, 1], strides = [1, 1, 1]} : vector<2x16x16xf32> to vector<2x16x1xf32>
    %63 = vector.extract_strided_slice %1 {offsets = [0, 10, 0], sizes = [2, 1, 32], strides = [1, 1, 1]} : vector<2x16x32xf32> to vector<2x1x32xf32>
    %64 = vector.broadcast %62 : vector<2x16x1xf32> to vector<2x16x32xf32>
    %65 = vector.broadcast %63 : vector<2x1x32xf32> to vector<2x16x32xf32>
    %66 = arith.mulf %64, %65 : vector<2x16x32xf32>
    %67 = arith.addf %61, %66 : vector<2x16x32xf32>
    %68 = vector.extract_strided_slice %0 {offsets = [0, 0, 11], sizes = [2, 16, 1], strides = [1, 1, 1]} : vector<2x16x16xf32> to vector<2x16x1xf32>
    %69 = vector.extract_strided_slice %1 {offsets = [0, 11, 0], sizes = [2, 1, 32], strides = [1, 1, 1]} : vector<2x16x32xf32> to vector<2x1x32xf32>
    %70 = vector.broadcast %68 : vector<2x16x1xf32> to vector<2x16x32xf32>
    %71 = vector.broadcast %69 : vector<2x1x32xf32> to vector<2x16x32xf32>
    %72 = arith.mulf %70, %71 : vector<2x16x32xf32>
    %73 = arith.addf %67, %72 : vector<2x16x32xf32>
    %74 = vector.extract_strided_slice %0 {offsets = [0, 0, 12], sizes = [2, 16, 1], strides = [1, 1, 1]} : vector<2x16x16xf32> to vector<2x16x1xf32>
    %75 = vector.extract_strided_slice %1 {offsets = [0, 12, 0], sizes = [2, 1, 32], strides = [1, 1, 1]} : vector<2x16x32xf32> to vector<2x1x32xf32>
    %76 = vector.broadcast %74 : vector<2x16x1xf32> to vector<2x16x32xf32>
    %77 = vector.broadcast %75 : vector<2x1x32xf32> to vector<2x16x32xf32>
    %78 = arith.mulf %76, %77 : vector<2x16x32xf32>
    %79 = arith.addf %73, %78 : vector<2x16x32xf32>
    %80 = vector.extract_strided_slice %0 {offsets = [0, 0, 13], sizes = [2, 16, 1], strides = [1, 1, 1]} : vector<2x16x16xf32> to vector<2x16x1xf32>
    %81 = vector.extract_strided_slice %1 {offsets = [0, 13, 0], sizes = [2, 1, 32], strides = [1, 1, 1]} : vector<2x16x32xf32> to vector<2x1x32xf32>
    %82 = vector.broadcast %80 : vector<2x16x1xf32> to vector<2x16x32xf32>
    %83 = vector.broadcast %81 : vector<2x1x32xf32> to vector<2x16x32xf32>
    %84 = arith.mulf %82, %83 : vector<2x16x32xf32>
    %85 = arith.addf %79, %84 : vector<2x16x32xf32>
    %86 = vector.extract_strided_slice %0 {offsets = [0, 0, 14], sizes = [2, 16, 1], strides = [1, 1, 1]} : vector<2x16x16xf32> to vector<2x16x1xf32>
    %87 = vector.extract_strided_slice %1 {offsets = [0, 14, 0], sizes = [2, 1, 32], strides = [1, 1, 1]} : vector<2x16x32xf32> to vector<2x1x32xf32>
    %88 = vector.broadcast %86 : vector<2x16x1xf32> to vector<2x16x32xf32>
    %89 = vector.broadcast %87 : vector<2x1x32xf32> to vector<2x16x32xf32>
    %90 = arith.mulf %88, %89 : vector<2x16x32xf32>
    %91 = arith.addf %85, %90 : vector<2x16x32xf32>
    %92 = vector.extract_strided_slice %0 {offsets = [0, 0, 15], sizes = [2, 16, 1], strides = [1, 1, 1]} : vector<2x16x16xf32> to vector<2x16x1xf32>
    %93 = vector.extract_strided_slice %1 {offsets = [0, 15, 0], sizes = [2, 1, 32], strides = [1, 1, 1]} : vector<2x16x32xf32> to vector<2x1x32xf32>
    %94 = vector.broadcast %92 : vector<2x16x1xf32> to vector<2x16x32xf32>
    %95 = vector.broadcast %93 : vector<2x1x32xf32> to vector<2x16x32xf32>
    %96 = arith.mulf %94, %95 : vector<2x16x32xf32>
    %97 = arith.addf %91, %96 : vector<2x16x32xf32>
    %98 = vector.extract_strided_slice %0 {offsets = [0, 0, 0], sizes = [2, 16, 1], strides = [1, 1, 1]} : vector<2x16x16xf32> to vector<2x16x1xf32>
    %99 = vector.extract_strided_slice %97 {offsets = [0, 0, 0], sizes = [2, 1, 32], strides = [1, 1, 1]} : vector<2x16x32xf32> to vector<2x1x32xf32>
    %100 = vector.broadcast %98 : vector<2x16x1xf32> to vector<2x16x32xf32>
    %101 = vector.broadcast %99 : vector<2x1x32xf32> to vector<2x16x32xf32>
    %102 = arith.mulf %100, %101 : vector<2x16x32xf32>
    %103 = vector.extract_strided_slice %0 {offsets = [0, 0, 1], sizes = [2, 16, 1], strides = [1, 1, 1]} : vector<2x16x16xf32> to vector<2x16x1xf32>
    %104 = vector.extract_strided_slice %97 {offsets = [0, 1, 0], sizes = [2, 1, 32], strides = [1, 1, 1]} : vector<2x16x32xf32> to vector<2x1x32xf32>
    %105 = vector.broadcast %103 : vector<2x16x1xf32> to vector<2x16x32xf32>
    %106 = vector.broadcast %104 : vector<2x1x32xf32> to vector<2x16x32xf32>
    %107 = arith.mulf %105, %106 : vector<2x16x32xf32>
    %108 = arith.addf %102, %107 : vector<2x16x32xf32>
    %109 = vector.extract_strided_slice %0 {offsets = [0, 0, 2], sizes = [2, 16, 1], strides = [1, 1, 1]} : vector<2x16x16xf32> to vector<2x16x1xf32>
    %110 = vector.extract_strided_slice %97 {offsets = [0, 2, 0], sizes = [2, 1, 32], strides = [1, 1, 1]} : vector<2x16x32xf32> to vector<2x1x32xf32>
    %111 = vector.broadcast %109 : vector<2x16x1xf32> to vector<2x16x32xf32>
    %112 = vector.broadcast %110 : vector<2x1x32xf32> to vector<2x16x32xf32>
    %113 = arith.mulf %111, %112 : vector<2x16x32xf32>
    %114 = arith.addf %108, %113 : vector<2x16x32xf32>
    %115 = vector.extract_strided_slice %0 {offsets = [0, 0, 3], sizes = [2, 16, 1], strides = [1, 1, 1]} : vector<2x16x16xf32> to vector<2x16x1xf32>
    %116 = vector.extract_strided_slice %97 {offsets = [0, 3, 0], sizes = [2, 1, 32], strides = [1, 1, 1]} : vector<2x16x32xf32> to vector<2x1x32xf32>
    %117 = vector.broadcast %115 : vector<2x16x1xf32> to vector<2x16x32xf32>
    %118 = vector.broadcast %116 : vector<2x1x32xf32> to vector<2x16x32xf32>
    %119 = arith.mulf %117, %118 : vector<2x16x32xf32>
    %120 = arith.addf %114, %119 : vector<2x16x32xf32>
    %121 = vector.extract_strided_slice %0 {offsets = [0, 0, 4], sizes = [2, 16, 1], strides = [1, 1, 1]} : vector<2x16x16xf32> to vector<2x16x1xf32>
    %122 = vector.extract_strided_slice %97 {offsets = [0, 4, 0], sizes = [2, 1, 32], strides = [1, 1, 1]} : vector<2x16x32xf32> to vector<2x1x32xf32>
    %123 = vector.broadcast %121 : vector<2x16x1xf32> to vector<2x16x32xf32>
    %124 = vector.broadcast %122 : vector<2x1x32xf32> to vector<2x16x32xf32>
    %125 = arith.mulf %123, %124 : vector<2x16x32xf32>
    %126 = arith.addf %120, %125 : vector<2x16x32xf32>
    %127 = vector.extract_strided_slice %0 {offsets = [0, 0, 5], sizes = [2, 16, 1], strides = [1, 1, 1]} : vector<2x16x16xf32> to vector<2x16x1xf32>
    %128 = vector.extract_strided_slice %97 {offsets = [0, 5, 0], sizes = [2, 1, 32], strides = [1, 1, 1]} : vector<2x16x32xf32> to vector<2x1x32xf32>
    %129 = vector.broadcast %127 : vector<2x16x1xf32> to vector<2x16x32xf32>
    %130 = vector.broadcast %128 : vector<2x1x32xf32> to vector<2x16x32xf32>
    %131 = arith.mulf %129, %130 : vector<2x16x32xf32>
    %132 = arith.addf %126, %131 : vector<2x16x32xf32>
    %133 = vector.extract_strided_slice %0 {offsets = [0, 0, 6], sizes = [2, 16, 1], strides = [1, 1, 1]} : vector<2x16x16xf32> to vector<2x16x1xf32>
    %134 = vector.extract_strided_slice %97 {offsets = [0, 6, 0], sizes = [2, 1, 32], strides = [1, 1, 1]} : vector<2x16x32xf32> to vector<2x1x32xf32>
    %135 = vector.broadcast %133 : vector<2x16x1xf32> to vector<2x16x32xf32>
    %136 = vector.broadcast %134 : vector<2x1x32xf32> to vector<2x16x32xf32>
    %137 = arith.mulf %135, %136 : vector<2x16x32xf32>
    %138 = arith.addf %132, %137 : vector<2x16x32xf32>
    %139 = vector.extract_strided_slice %0 {offsets = [0, 0, 7], sizes = [2, 16, 1], strides = [1, 1, 1]} : vector<2x16x16xf32> to vector<2x16x1xf32>
    %140 = vector.extract_strided_slice %97 {offsets = [0, 7, 0], sizes = [2, 1, 32], strides = [1, 1, 1]} : vector<2x16x32xf32> to vector<2x1x32xf32>
    %141 = vector.broadcast %139 : vector<2x16x1xf32> to vector<2x16x32xf32>
    %142 = vector.broadcast %140 : vector<2x1x32xf32> to vector<2x16x32xf32>
    %143 = arith.mulf %141, %142 : vector<2x16x32xf32>
    %144 = arith.addf %138, %143 : vector<2x16x32xf32>
    %145 = vector.extract_strided_slice %0 {offsets = [0, 0, 8], sizes = [2, 16, 1], strides = [1, 1, 1]} : vector<2x16x16xf32> to vector<2x16x1xf32>
    %146 = vector.extract_strided_slice %97 {offsets = [0, 8, 0], sizes = [2, 1, 32], strides = [1, 1, 1]} : vector<2x16x32xf32> to vector<2x1x32xf32>
    %147 = vector.broadcast %145 : vector<2x16x1xf32> to vector<2x16x32xf32>
    %148 = vector.broadcast %146 : vector<2x1x32xf32> to vector<2x16x32xf32>
    %149 = arith.mulf %147, %148 : vector<2x16x32xf32>
    %150 = arith.addf %144, %149 : vector<2x16x32xf32>
    %151 = vector.extract_strided_slice %0 {offsets = [0, 0, 9], sizes = [2, 16, 1], strides = [1, 1, 1]} : vector<2x16x16xf32> to vector<2x16x1xf32>
    %152 = vector.extract_strided_slice %97 {offsets = [0, 9, 0], sizes = [2, 1, 32], strides = [1, 1, 1]} : vector<2x16x32xf32> to vector<2x1x32xf32>
    %153 = vector.broadcast %151 : vector<2x16x1xf32> to vector<2x16x32xf32>
    %154 = vector.broadcast %152 : vector<2x1x32xf32> to vector<2x16x32xf32>
    %155 = arith.mulf %153, %154 : vector<2x16x32xf32>
    %156 = arith.addf %150, %155 : vector<2x16x32xf32>
    %157 = vector.extract_strided_slice %0 {offsets = [0, 0, 10], sizes = [2, 16, 1], strides = [1, 1, 1]} : vector<2x16x16xf32> to vector<2x16x1xf32>
    %158 = vector.extract_strided_slice %97 {offsets = [0, 10, 0], sizes = [2, 1, 32], strides = [1, 1, 1]} : vector<2x16x32xf32> to vector<2x1x32xf32>
    %159 = vector.broadcast %157 : vector<2x16x1xf32> to vector<2x16x32xf32>
    %160 = vector.broadcast %158 : vector<2x1x32xf32> to vector<2x16x32xf32>
    %161 = arith.mulf %159, %160 : vector<2x16x32xf32>
    %162 = arith.addf %156, %161 : vector<2x16x32xf32>
    %163 = vector.extract_strided_slice %0 {offsets = [0, 0, 11], sizes = [2, 16, 1], strides = [1, 1, 1]} : vector<2x16x16xf32> to vector<2x16x1xf32>
    %164 = vector.extract_strided_slice %97 {offsets = [0, 11, 0], sizes = [2, 1, 32], strides = [1, 1, 1]} : vector<2x16x32xf32> to vector<2x1x32xf32>
    %165 = vector.broadcast %163 : vector<2x16x1xf32> to vector<2x16x32xf32>
    %166 = vector.broadcast %164 : vector<2x1x32xf32> to vector<2x16x32xf32>
    %167 = arith.mulf %165, %166 : vector<2x16x32xf32>
    %168 = arith.addf %162, %167 : vector<2x16x32xf32>
    %169 = vector.extract_strided_slice %0 {offsets = [0, 0, 12], sizes = [2, 16, 1], strides = [1, 1, 1]} : vector<2x16x16xf32> to vector<2x16x1xf32>
    %170 = vector.extract_strided_slice %97 {offsets = [0, 12, 0], sizes = [2, 1, 32], strides = [1, 1, 1]} : vector<2x16x32xf32> to vector<2x1x32xf32>
    %171 = vector.broadcast %169 : vector<2x16x1xf32> to vector<2x16x32xf32>
    %172 = vector.broadcast %170 : vector<2x1x32xf32> to vector<2x16x32xf32>
    %173 = arith.mulf %171, %172 : vector<2x16x32xf32>
    %174 = arith.addf %168, %173 : vector<2x16x32xf32>
    %175 = vector.extract_strided_slice %0 {offsets = [0, 0, 13], sizes = [2, 16, 1], strides = [1, 1, 1]} : vector<2x16x16xf32> to vector<2x16x1xf32>
    %176 = vector.extract_strided_slice %97 {offsets = [0, 13, 0], sizes = [2, 1, 32], strides = [1, 1, 1]} : vector<2x16x32xf32> to vector<2x1x32xf32>
    %177 = vector.broadcast %175 : vector<2x16x1xf32> to vector<2x16x32xf32>
    %178 = vector.broadcast %176 : vector<2x1x32xf32> to vector<2x16x32xf32>
    %179 = arith.mulf %177, %178 : vector<2x16x32xf32>
    %180 = arith.addf %174, %179 : vector<2x16x32xf32>
    %181 = vector.extract_strided_slice %0 {offsets = [0, 0, 14], sizes = [2, 16, 1], strides = [1, 1, 1]} : vector<2x16x16xf32> to vector<2x16x1xf32>
    %182 = vector.extract_strided_slice %97 {offsets = [0, 14, 0], sizes = [2, 1, 32], strides = [1, 1, 1]} : vector<2x16x32xf32> to vector<2x1x32xf32>
    %183 = vector.broadcast %181 : vector<2x16x1xf32> to vector<2x16x32xf32>
    %184 = vector.broadcast %182 : vector<2x1x32xf32> to vector<2x16x32xf32>
    %185 = arith.mulf %183, %184 : vector<2x16x32xf32>
    %186 = arith.addf %180, %185 : vector<2x16x32xf32>
    %187 = vector.extract_strided_slice %0 {offsets = [0, 0, 15], sizes = [2, 16, 1], strides = [1, 1, 1]} : vector<2x16x16xf32> to vector<2x16x1xf32>
    %188 = vector.extract_strided_slice %97 {offsets = [0, 15, 0], sizes = [2, 1, 32], strides = [1, 1, 1]} : vector<2x16x32xf32> to vector<2x1x32xf32>
    %189 = vector.broadcast %187 : vector<2x16x1xf32> to vector<2x16x32xf32>
    %190 = vector.broadcast %188 : vector<2x1x32xf32> to vector<2x16x32xf32>
    %191 = arith.mulf %189, %190 : vector<2x16x32xf32>
    %192 = arith.addf %186, %191 : vector<2x16x32xf32>
    %193 = vector.shape_cast %192 : vector<2x16x32xf32> to vector<32x32xf32>
    %cst = arith.constant dense<0.000000e+00> : vector<32x64xf32>
    %194 = tpu.matmul %193, %2, %cst {dimension_numbers = #tpu.dot_dimension_numbers<[1], [0], [0], [1], [0, 0, 1, 1], [], []>} : vector<32x32xf32>, vector<32x64xf32>, vector<32x64xf32> -> vector<32x64xf32>
    %195 = vector.shape_cast %194 : vector<32x64xf32> to vector<2x16x64xf32>
    %c0_7 = arith.constant 0 : index
    %c0_8 = arith.constant 0 : index
    %c0_9 = arith.constant 0 : index
    %196 = vector.load %arg4[%c0_7, %c0_8, %c0_9] : memref<2x16x64xf32, #tpu.memory_space<vmem>>, vector<2x16x64xf32>
    tpu.vector_store %arg4[%c0_7, %c0_8, %c0_9], %195 {strides = array<i32>} : memref<2x16x64xf32, #tpu.memory_space<vmem>>, vector<2x16x64xf32>,
    return
  }
  func.func @transform_0(%arg0: i32) -> (i32, i32, i32) {
    %c0_i32 = arith.constant 0 : i32
    %c0_i32_0 = arith.constant 0 : i32
    %c0_i32_1 = arith.constant 0 : i32
    return %arg0, %c0_i32, %c0_i32_0 : i32, i32, i32
  }
  func.func @transform_1(%arg0: i32) -> (i32, i32, i32) {
    %c0_i32 = arith.constant 0 : i32
    %c0_i32_0 = arith.constant 0 : i32
    %c0_i32_1 = arith.constant 0 : i32
    return %arg0, %c0_i32, %c0_i32_0 : i32, i32, i32
  }
  func.func @transform_2(%arg0: i32) -> (i32, i32) {
    %c0_i32 = arith.constant 0 : i32
    %c0_i32_0 = arith.constant 0 : i32
    %c0_i32_1 = arith.constant 0 : i32
    return %c0_i32, %c0_i32_0 : i32, i32
  }
  func.func @transform_3(%arg0: i32) -> (i32, i32, i32) {
    %c0_i32 = arith.constant 0 : i32
    %c0_i32_0 = arith.constant 0 : i32
    %c0_i32_1 = arith.constant 0 : i32
    return %arg0, %c0_i32, %c0_i32_0 : i32, i32, i32
  }
}

</mosaic_0001>

<bundles_post_ra>
// kernel: tpu_custom_call.1
= control target key start
LH: loop header
LB: loop body
LE: loop exit
PB: predicated region body
PF: predicated region fallthrough
CT: control target
= control target key end

     0   :  { %s2550_s0 = inlined_call_operand.hbm [shape: f32[8,16,16], index: 0, kind: input, shape index: {}]   ;;  %s2551_s1 = inlined_call_operand.hbm [shape: f32[8,16,32], index: 1, kind: input, shape index: {}]   ;;  %s2552_s2 = inlined_call_operand.hbm [shape: f32[32,64], index: 2, kind: input, shape index: {}]   ;;  %s2553_s3 = inlined_call_operand.hbm [shape: f32[8,16,64], index: 3, kind: output, shape index: {}]  }
   0x1   :  { %2620 = sst [smem:[#allocation66_spill]] %s2550_s0 }
   0x2   :  { %2621 = sst [smem:[#allocation67_spill]] %s2552_s2 }
   0x3   :  { %8 = vsyncpa [#allocation3], 0 }
   0x4   :  { %10 = vsyncpa [#allocation3 + $0x1], 0 }
   0x5   :  { %11 = vsyncpa [#allocation6], 0 }
   0x6   :  { %13 = vsyncpa [#allocation6 + $0x1], 0 }
   0x7   :  { %14 = vsyncpa [#allocation4], 0 }
   0x8   :  { %16 = vsyncpa [#allocation4 + $0x1], 0  ;;  %s1653_s12 = smov 0   ;;  %s1655_s13 = smov 0  }
   0x9   :  { %s1657_s14 = smov 0   ;;  %s1659_s15 = smov 0  }
   0xa LB: > { %s1674_s16 = sadd.s32 4294967295, %s1607_s15   ;;  %s1247_s17 = sadd.s32 4294967294, %s1607_s15   ;;  %s1607_s15 = sphi %s1659_s15, %s2747_s15   ;;  %s1603_s14 = sphi %s1657_s14, %s2746_s14   ;;  %s1599_s13 = sphi %s1655_s13, %s2745_s13   ;;  %s1595_s12 = sphi %s1653_s12, %s2744_s12  }
   0xb   : > { %p42_p0 = scmp.ne.s32.totalorder %s1599_s13, %s1595_s12  ;;  %p2554_p1 = scmp.eq.s32.totalorder %s1674_s16, 0 }
   0xc   : > { %p119_p3 = scmp.eq.s32.totalorder %s1247_s17, 3  ;;  %p1248_p5 = scmp.ge.s32.totalorder %s1607_s15, 1 }
   0xd   : > { %p1683_p4 = por %p2554_p1, %p42_p0  ;;  %p126_p7 = scmp.lt.s32.totalorder %s1607_s15, 5 }
   0xe   : > { %p1688_p6 = por %p119_p3, %p42_p0  ;;  %s1609_s21 = smov [#allocation7]  }
   0xf   : > { %s2622_s18 = scalar_select %p1683_p4, 1, 0 }
  0x10   : > { %s2623_s19 = scalar_select %p1688_p6, 1, 0 }
  0x11   : > { %p1693_p8 = pnand %p1248_p5, %p126_p7  ;;  %s138_s22 = sshll.u32 %s1609_s21, 4  ;;  %s139_s22 = int_to_ptr.vmem [resolvable:$true] %s138_s22 }
  0x12   : > { %s1706_s24 = sadd.s32 1, %s1607_s15   ;;  %s29_s25 = sadd.s32 1, %s1603_s14 }
  0x13   : > { %s2624_s20 = scalar_select %p1693_p8, 1, 0 }
  0x14   : > { %p1324_p9 = pneg %p1693_p8  ;;  %s26_s26 = ssub.s32 %s1607_s15, %s1706_s24 }
  0x15   : > { %s2626_s2 = sld [smem:[#allocation67_spill]] }
  0x16   : > { %p1701_p10 = pnand %p1324_p9, %p2554_p1 }
  0x18   : > { %p1447_p12 = pneg %p1701_p10 }
  0x1b   : > { %s1445_s29 = scalar_lea.hbm %s2626_s2, 512 }
  0x1c   : > { %p1446_p11 = scmp.ne.s32.totalorder %s2626_s2, %s1445_s29  ;;  %p1452_p3 = scmp.lt.u32.totalorder %s1445_s29, %s2626_s2 }
  0x1e   : > { %p1448_p13 = pnand %p1447_p12, %p1446_p11 }
  0x20   : > { %p1449_p0 = pneg %p1448_p13 }
  0x22   : > { %p1454_p5 = pnand %p1452_p3, %p1449_p0 }
  0x24   : > { %1457 = shalt.err (!%p1454_p5)
}
  0x25   : > { %s1458_s7 = scalar_lea.vmem %s139_s22, 512  ;;  %p1466_p2 = scmp.lt.s32.totalorder %s139_s22, %s139_s22 }
  0x26   : > { %p1459_p7 = scmp.ne.s32.totalorder %s139_s22, %s1458_s7  ;;  %p1467_p6 = scmp.lt.s32.totalorder %s1458_s7, %s1458_s7 }
  0x28   : > { %p1461_p9 = pnand %p1459_p7, %p1447_p12  ;;  %p1468_p4 = por %p1467_p6, %p1466_p2 }
  0x2a   : > { %p1462_p1 = pneg %p1461_p9 }
  0x2c   : > { %p1469_p8 = pnand %p1468_p4, %p1462_p1 }
  0x2e   : > { %1472 = shalt.err (!%p1469_p8)
}
  0x2f   : > { %s2557_s8 = smov 128   ;;  %s2559_s9 = smov 8  }
  0x30   : > { %1327 = dma.hbm_to_vmem [thread:$0]  (!%p1701_p10), %s2626_s2, 512, %s139_s22, [#allocation6], %s2557_s8, %s2557_s8, %s2559_s9  }
  0x31   : > { %p27_p1 = scmp.eq.s32.totalorder %s26_s26, 0  ;;  %p36_p2 = scmp.ne.s32.totalorder %s1603_s14, %s1599_s13 }
  0x32   : > { %p37_p4 = scmp.eq.s32.totalorder %s1607_s15, 0  ;;  %p1340_p6 = scmp.lt.s32.totalorder %s1607_s15, 4 }
  0x33   : > { %s1735_s17 = scalar_select %p27_p1, %s1603_s14, %s29_s25  }
  0x34   : > { %p38_p8 = por %p37_p4, %p36_p2  ;;  %p2627_p11 = scmp.eq.s32.totalorder %s1674_s16, 3 }
  0x35   : > { %s152_s23 = sand.u32 1, %s1603_s14   ;;  %s1275_s27 = sshll.u32 %s1607_s15, 9 }
  0x36   : > { %p1739_p12 = por %p2627_p11, %p36_p2  ;;  %s1745_s28 = sshll.u32 %s152_s23, 5 }
  0x37   : > { %s2629_s0 = sld [smem:[#allocation66_spill]]  ;;  %s156_s25 = scalar_lea.vmem [#allocation2], %s1745_s28 }
  0x38   : > { %s164_s26 = sshll.u32 %s156_s25, 4  ;;  %p1753_p10 = pnand %p1340_p6, %p38_p8  ;;  %s1757_s26 = int_to_ptr.vmem [resolvable:$true] %s164_s26 }
  0x39   : > { %s1762_s7 = scalar_lea.hbm %s2551_s1, %s1275_s27  ;;  %s1764_s10 = scalar_lea.sflag [#allocation3], %s152_s23 }
  0x3a   : > { %p1475_p0 = pneg %p1753_p10 }
  0x3d   : > { %s1750_s22 = scalar_lea.hbm %s2629_s0, %s1275_s27  ;;  %s1478_s25 = scalar_lea.hbm %s2629_s0, 2048 }
  0x3e   : > { %s1473_s11 = scalar_lea.hbm %s1750_s22, 512  ;;  %p1479_p7 = scmp.lt.u32.totalorder %s1750_s22, %s2629_s0 }
  0x3f   : > { %p1474_p13 = scmp.ne.s32.totalorder %s1750_s22, %s1473_s11  ;;  %p1480_p9 = scmp.lt.u32.totalorder %s1478_s25, %s1473_s11 }
  0x40   : > { %p1482_p2 = scmp.lt.u32.totalorder %s1473_s11, %s1750_s22 }
  0x41   : > { %p1476_p3 = pnand %p1475_p0, %p1474_p13  ;;  %p1481_p1 = por %p1480_p9, %p1479_p7 }
  0x43   : > { %p1477_p5 = pneg %p1476_p3  ;;  %p1483_p4 = por %p1482_p2, %p1481_p1 }
  0x45   : > { %p1484_p6 = pnand %p1483_p4, %p1477_p5 }
  0x47   : > { %1487 = shalt.err (!%p1484_p6)
}
  0x48   : > { %s1488_s23 = scalar_lea.vmem %s1757_s26, 512  ;;  %s1612_s27 = smov [#allocation2]  }
  0x49   : > { %p1489_p8 = scmp.ne.s32.totalorder %s1757_s26, %s1488_s23  ;;  %s1493_s5 = sshll.u32 %s1612_s27, 4  ;;  %s1494_s5 = int_to_ptr.vmem [resolvable:$false] %s1493_s5 }
  0x4a   : > { %s1495_s8 = scalar_lea.vmem %s1494_s5, 1024  ;;  %p1496_p3 = scmp.lt.s32.totalorder %s1757_s26, %s1494_s5 }
  0x4b   : > { %p1491_p11 = pnand %p1489_p8, %p1475_p0  ;;  %p1497_p7 = scmp.lt.s32.totalorder %s1495_s8, %s1488_s23 }
  0x4d   : > { %p1492_p13 = pneg %p1491_p11  ;;  %p1498_p9 = por %p1497_p7, %p1496_p3 }
  0x4f   : > { %p1499_p1 = pnand %p1498_p9, %p1492_p13 }
  0x51   : > { %1502 = shalt.err (!%p1499_p1)
}
  0x52   : > { %s2631_s9 = smov 8   ;;  %s2632_s6 = smov 128  }
  0x53   : > { %1331 = dma.hbm_to_vmem [thread:$0]  (!%p1753_p10), %s1750_s22, 512, %s1757_s26, %s1764_s10, %s2632_s6, %s2632_s6, %s2631_s9  }
  0x54   : > { %s178_s11 = scalar_lea.vmem [#allocation5], %s1745_s28  ;;  %s174_s30 = sand.u32 1, %s1607_s15  }
  0x55   : > { %s186_s29 = sshll.u32 %s178_s11, 4  ;;  %s1799_s25 = scalar_lea.sflag [#allocation6], %s174_s30  ;;  %s1797_s29 = int_to_ptr.vmem [resolvable:$true] %s186_s29 }
  0x56   : > { %s1503_s23 = scalar_lea.hbm %s1762_s7, 512  ;;  %s1508_s8 = scalar_lea.hbm %s2551_s1, 2048 }
  0x57   : > { %p1504_p5 = scmp.ne.s32.totalorder %s1762_s7, %s1503_s23  ;;  %p1509_p6 = scmp.lt.u32.totalorder %s1762_s7, %s2551_s1 }
  0x58   : > { %p1510_p8 = scmp.lt.u32.totalorder %s1508_s8, %s1503_s23  ;;  %p1512_p13 = scmp.lt.u32.totalorder %s1503_s23, %s1762_s7 }
  0x59   : > { %p1506_p2 = pnand %p1504_p5, %p1475_p0 }
  0x5a   : > { %p1511_p11 = por %p1510_p8, %p1509_p6 }
  0x5b   : > { %p1507_p4 = pneg %p1506_p2 }
  0x5c   : > { %p1513_p3 = por %p1512_p13, %p1511_p11 }
  0x5e   : > { %p1514_p7 = pnand %p1513_p3, %p1507_p4 }
  0x60   : > { %1517 = shalt.err (!%p1514_p7)
}
  0x61   : > { %s1518_s28 = scalar_lea.vmem %s1797_s29, 512  ;;  %s1613_s22 = smov [#allocation5]  }
  0x62   : > { %p1519_p9 = scmp.ne.s32.totalorder %s1797_s29, %s1518_s28  ;;  %s1523_s26 = sshll.u32 %s1613_s22, 4  ;;  %s1524_s26 = int_to_ptr.vmem [resolvable:$false] %s1523_s26 }
  0x63   : > { %s1525_s0 = scalar_lea.vmem %s1524_s26, 1024  ;;  %p1526_p2 = scmp.lt.s32.totalorder %s1797_s29, %s1524_s26 }
  0x64   : > { %p1521_p1 = pnand %p1519_p9, %p1475_p0  ;;  %p1527_p6 = scmp.lt.s32.totalorder %s1525_s0, %s1518_s28 }
  0x66   : > { %p1522_p5 = pneg %p1521_p1  ;;  %p1528_p8 = por %p1527_p6, %p1526_p2 }
  0x68   : > { %p1529_p11 = pnand %p1528_p8, %p1522_p5 }
  0x6a   : > { %1532 = shalt.err (!%p1529_p11)
}
  0x6b   : > { %1334 = dma.hbm_to_vmem [thread:$0]  (!%p1753_p10), %s1762_s7, 512, %s1797_s29, %s1799_s25, %s2632_s6, %s2632_s6, %s2631_s9  }
  0x6c   : > { %p2633_p0 = scmp.ne.s32.totalorder %s2624_s20, 0 }
  0x6e   : > { %198 = sbr.rel (%p2633_p0) target bundleno = 707 (0x2c3), region = 32 }
  0x75   : > { %s1831_s2 = sand.u32 1, %s1599_s13   ;;  %p2634_p4 = scmp.ne.s32.totalorder %s2622_s18, 0 }
  0x76   : > { %s1834_s10 = sshll.u32 %s1831_s2, 5  ;;  %s201_s4 = scalar_lea.sflag [#allocation3], %s1831_s2 }
  0x77   : > { %s1838_s11 = scalar_lea.vmem [#allocation2], %s1834_s10 }
  0x78   : > { %1578 = dma.done.wait (%p2634_p4), %s201_s4, 512  }
  0x79   : > { %1580 = vsyncadd (%p2634_p4), %s201_s4, 4294966784  ;;  %s209_s20 = sand.u32 1, %s1674_s16   ;;  %s1846_s9 = scalar_lea.vmem [#allocation5], %s1834_s10 }
  0x7a   : > { %s210_s7 = scalar_lea.sflag [#allocation6], %s209_s20 }
  0x7b   : > { %1582 = dma.done.wait (%p2634_p4), %s210_s7, 512  }
  0x7c   : > { %1584 = vsyncadd (%p2634_p4), %s210_s7, 4294966784  ;;  %p2635_p10 = scmp.eq.s32.totalorder %s1674_s16, 0 }
  0x7e   : > { %1586 = dma.done.wait (%p2635_p10), [#allocation6], 512   ;;  %p2636_p13 = pmov %p2635_p10 }
  0x7f   : > { %v1614_v0 = vmov 3   ;;  %v1615_v1 = vmov 1   ;;  %v1858_v2 = vld [vmem:[%s1838_s11 + $0x10] sm:$0xff]  ;;  %v1861_v3 = vld [vmem:[%s1838_s11] sm:$0xff]  ;;  %v1616_v4 = vmov 6   ;;  %v1617_v5 = vmov 2  }
  0x80   : > { %1588 = vsyncadd (%p2636_p13), [#allocation6], 4294966784  ;;  %1399 = vset.pattern.permute.xlu0 %v1614_v0  ;;  %1396 = vset.pattern.permute.xlu1 %v1615_v1  ;;  %v1618_v6 = vmov 0   ;;  %v1874_v7 = vld [vmem:[%s1838_s11 + $0x8] sm:$0xff]  ;;  %v1619_v8 = vmov 4   ;;  %v1879_v9 = vld [vmem:[%s1838_s11 + $0x18] sm:$0xff]  ;;  %v280_v52 = vlaneseq }
  0x81   : > { %365 = vperm.xlu0 %1399, %v1858_v2   ;;  %293 = vperm.xlu1 %1396, %v1861_v3   ;;  %v1620_v10 = vmov 5   ;;  %v1621_v11 = vmov 9   ;;  %v1622_v12 = vmov 7   ;;  %v1623_v13 = vmov 12   ;;  %v256_v49 = vld [vmem:[#allocation7] sm:$0xff]  ;;  %v257_v50 = vld [vmem:[#allocation7 + $0x8] sm:$0xff] }
  0x82   : > { %v1624_v14 = vmov 8   ;;  %v1625_v15 = vmov 13   ;;  %v1626_v16 = vmov 15   ;;  %v1627_v17 = vmov 10   ;;  %v258_v53 = vld [vmem:[#allocation7 + $0x10] sm:$0xff]  ;;  %v259_v54 = vld [vmem:[#allocation7 + $0x18] sm:$0xff] }
  0x83   : > { %v1628_v18 = vmov 11   ;;  %v1629_v19 = vmov 14   ;;  %v1302_v51 = vpack.c.bf16 %v257_v50, %v256_v49  ;;  %v1306_v56 = vpack.c.bf16 %v259_v54, %v258_v53  ;;  %v254_v60 = vld [vmem:[%s1846_s9 + $0x10] sm:$0xff]  ;;  %s244_s18 = scalar_lea.vmem [#allocation8], %s1834_s10  ;;  %s1279_s29 = sshll.u32 %s1674_s16, 9 }
  0x84   : > { %v281_v58 = vshrl.u32 %v280_v52, 7  ;;  %vm1024_vm0 = vcmask 261120   ;;  %vm1122_vm1 = vcmask 523264   ;;  %s1142_s6 = sshll.u32 %s244_s18, 4  ;;  %s2507_s23 = scalar_lea.hbm %s2553_s3, %s1279_s29  ;;  %s2502_s6 = int_to_ptr.vmem [resolvable:$true] %s1142_s6 }
  0x85   : > { %1403 = vset.pattern.permute.xlu0 %v1616_v4  ;;  %301 = vperm.xlu1 %1396, %v1858_v2   ;;  %s1128_s27 = scalar_lea.sflag [#allocation4], %s1831_s2  ;;  %s1533_s5 = scalar_lea.vmem %s2502_s6, 512 }
  0x86   : > { %461 = vperm.xlu0 %1403, %v1858_v2   ;;  %1303 = vmatprep.subr.bf16.mxu0 %v1302_v51  ;;  %v2020_v59 = vsub.s32 0, %v281_v58  ;;  %v2027_v63 = vsub.s32 1, %v281_v58  ;;  %v2074_v49 = vsub.s32 6, %v281_v58  ;;  %p1534_p3 = scmp.ne.s32.totalorder %s2502_s6, %s1533_s5  ;;  %s1630_s16 = smov [#allocation8]  }
  0x87   : > { %1310 = vmatprep.subr.bf16.mxu1 %v1302_v51  ;;  %1305 = vmatpush3.bf16.msra.mxu0 %v1302_v51  ;;  %s1537_s8 = sshll.u32 %s1630_s16, 4  ;;  %s1538_s8 = int_to_ptr.vmem [resolvable:$false] %s1537_s8 }
  0x88   : > { %1312 = vmatpush3.bf16.msra.mxu1 %v1302_v51  ;;  %1307 = vmatprep.subr.bf16.mxu0 %v1306_v56  ;;  %2658 = vst [vmem:[#allocation34_spill] sm:$0xff] %v2020_v59  ;;  %2661 = vst [vmem:[#allocation37_spill] sm:$0xff] %v2027_v63  ;;  %p1535_p7 = pnand %p1534_p3, %p1739_p12  ;;  %s1539_s28 = scalar_lea.vmem %s1538_s8, 1024 }
  0x89   : > { %1397 = vset.pattern.permute.xlu1 %v1617_v5  ;;  %1311 = vmatprep.subr.bf16.mxu1 %v1306_v56  ;;  %2670 = vst [vmem:[#allocation46_spill] sm:$0xff] %v2074_v49  ;;  %p1540_p1 = scmp.lt.s32.totalorder %s2502_s6, %s1538_s8  ;;  %p1541_p5 = scmp.lt.s32.totalorder %s1539_s28, %s1533_s5 }
  0x8a   : > { %1404 = vset.pattern.permute.xlu0 %v1618_v6  ;;  %333 = vperm.xlu1 %1397, %v1858_v2   ;;  %p1536_p9 = pneg %p1535_p7 }
  0x8b   : > { %262 = vperm.xlu0 %1404, %v1861_v3   ;;  %1309 = vmatpush3.bf16.msra.mxu0 %v1306_v56  ;;  %p1542_p2 = por %p1541_p5, %p1540_p1 }
  0x8c   : > { %1313 = vmatpush3.bf16.msra.mxu1 %v1306_v56 }
  0x8d   : > { %p1543_p6 = pnand %p1542_p2, %p1536_p9 }
  0x8e   : > { %1398 = vset.pattern.permute.xlu1 %v1614_v0 }
  0x8f   : > { %272 = vperm.xlu0 %1404, %v1858_v2   ;;  %357 = vperm.xlu1 %1398, %v1861_v3  }
  0x93   : > { %267 = vperm.xlu0 %1404, %v1874_v7   ;;  %1400 = vset.pattern.permute.xlu1 %v1619_v8 }
  0x94   : > { %389 = vperm.xlu1 %1400, %v1861_v3  }
  0x97   : > { %1408 = vset.pattern.permute.xlu0 %v1615_v1 }
  0x98   : > { %305 = vperm.xlu0 %1408, %v1879_v9   ;;  %397 = vperm.xlu1 %1400, %v1858_v2  }
  0x9c   : > { %1409 = vset.pattern.permute.xlu0 %v1617_v5  ;;  %1401 = vset.pattern.permute.xlu1 %v1620_v10 }
  0x9d   : > { %325 = vperm.xlu0 %1409, %v1861_v3   ;;  %429 = vperm.xlu1 %1401, %v1858_v2  }
  0xa1   : > { %329 = vperm.xlu0 %1409, %v1874_v7   ;;  %1402 = vset.pattern.permute.xlu1 %v1616_v4 }
  0xa2   : > { %453 = vperm.xlu1 %1402, %v1861_v3  }
  0xa5   : > { %1413 = vset.pattern.permute.xlu0 %v1621_v11 }
  0xa6   : > { %557 = vperm.xlu0 %1413, %v1858_v2   ;;  %1405 = vset.pattern.permute.xlu1 %v1622_v12 }
  0xa7   : > { %485 = vperm.xlu1 %1405, %v1861_v3  }
  0xaa   : > { %1417 = vset.pattern.permute.xlu0 %v1619_v8 }
  0xab   : > { %401 = vperm.xlu0 %1417, %v1879_v9   ;;  %493 = vperm.xlu1 %1405, %v1858_v2  }
  0xaf   : > { %1418 = vset.pattern.permute.xlu0 %v1620_v10  ;;  %1406 = vset.pattern.permute.xlu1 %v1618_v6 }
  0xb0   : > { %421 = vperm.xlu0 %1418, %v1861_v3   ;;  %277 = vperm.xlu1 %1406, %v1879_v9  }
  0xb4   : > { %425 = vperm.xlu0 %1418, %v1874_v7   ;;  %1407 = vset.pattern.permute.xlu1 %v1615_v1  ;;  %v2033_v1 = vrot.slane %v254_v60, %v2027_v63 }
  0xb5   : > { %297 = vperm.xlu1 %1407, %v1874_v7  }
  0xb8   : > { %1422 = vset.pattern.permute.xlu0 %v1623_v13 }
  0xb9   : > { %653 = vperm.xlu0 %1422, %v1858_v2   ;;  %1410 = vset.pattern.permute.xlu1 %v1624_v14 }
  0xba   : > { %517 = vperm.xlu1 %1410, %v1861_v3  }
  0xbd   : > { %1424 = vset.pattern.permute.xlu0 %v1625_v15 }
  0xbe   : > { %677 = vperm.xlu0 %1424, %v1861_v3   ;;  %525 = vperm.xlu1 %1410, %v1858_v2  }
  0xc2   : > { %1427 = vset.pattern.permute.xlu0 %v1622_v12  ;;  %1411 = vset.pattern.permute.xlu1 %v1617_v5  ;;  %v2041_v5 = vsub.s32 3, %v281_v58 }
  0xc3   : > { %497 = vperm.xlu0 %1427, %v1879_v9   ;;  %337 = vperm.xlu1 %1411, %v1879_v9  }
  0xc4   : > { %2664 = vst [vmem:[#allocation40_spill] sm:$0xff] %v2041_v5 }
  0xc7   : > { %1429 = vset.pattern.permute.xlu0 %v1624_v14  ;;  %1412 = vset.pattern.permute.xlu1 %v1621_v11 }
  0xc8   : > { %521 = vperm.xlu0 %1429, %v1874_v7   ;;  %549 = vperm.xlu1 %1412, %v1861_v3  }
  0xcc   : > { %1432 = vset.pattern.permute.xlu0 %v1626_v16  ;;  %1414 = vset.pattern.permute.xlu1 %v1614_v0  ;;  %v2030_v0 = vrot.slane %v254_v60, %v2020_v59 }
  0xcd   : > { %749 = vperm.xlu0 %1432, %v1858_v2   ;;  %361 = vperm.xlu1 %1414, %v1874_v7  }
  0xd1   : > { %1433 = vset.pattern.permute.xlu0 %v1627_v17  ;;  %369 = vperm.xlu1 %1414, %v1879_v9  }
  0xd2   : > { %581 = vperm.xlu0 %1433, %v1861_v3  }
  0xd5   : > { %1415 = vset.pattern.permute.xlu1 %v1627_v17 }
  0xd6   : > { %589 = vperm.xlu1 %1415, %v1858_v2   ;;  %585 = vperm.xlu0 %1433, %v1874_v7  }
  0xda   : > { %1416 = vset.pattern.permute.xlu1 %v1619_v8  ;;  %1437 = vset.pattern.permute.xlu0 %v1628_v18 }
  0xdb   : > { %393 = vperm.xlu1 %1416, %v1874_v7   ;;  %625 = vperm.xlu0 %1437, %v1879_v9  }
  0xdf   : > { %1419 = vset.pattern.permute.xlu1 %v1628_v18  ;;  %1439 = vset.pattern.permute.xlu0 %v1625_v15 }
  0xe0   : > { %613 = vperm.xlu1 %1419, %v1861_v3   ;;  %681 = vperm.xlu0 %1439, %v1874_v7  }
  0xe4   : > { %621 = vperm.xlu1 %1419, %v1858_v2   ;;  %1442 = vset.pattern.permute.xlu0 %v1629_v19 }
  0xe5   : > { %721 = vperm.xlu0 %1442, %v1879_v9  }
  0xe8   : > { %1420 = vset.pattern.permute.xlu1 %v1620_v10  ;;  %v2052_v10 = vrot.slane %v254_v60, %v2041_v5 }
  0xe9   : > { %433 = vperm.xlu1 %1420, %v1879_v9   ;;  %1444 = vset.pattern.permute.xlu0 %v1626_v16 }
  0xea   : > { %2667 = vst [vmem:[#allocation43_spill] sm:$0xff] %v2052_v10 }
  0xed   : > { %1421 = vset.pattern.permute.xlu1 %v1623_v13 }
  0xee   : > { %645 = vperm.xlu1 %1421, %v1861_v3  }
  0xf2   : > { %1423 = vset.pattern.permute.xlu1 %v1616_v4 }
  0xf3   : > { %457 = vperm.xlu1 %1423, %v1874_v7  }
  0xf7   : > { %465 = vperm.xlu1 %1423, %v1879_v9  }
  0xfb   : > { %1425 = vset.pattern.permute.xlu1 %v1625_v15 }
  0xfc   : > { %685 = vperm.xlu1 %1425, %v1858_v2  }
 0x100   : > { %1426 = vset.pattern.permute.xlu1 %v1622_v12  ;;  %v1938_v20 = vpop.permute.xlu1 %293  ;;  %v1964_v28 = vpop.permute.xlu0 %365 }
 0x101   : > { %2637 = vst [vmem:[#allocation13_spill] sm:$0xff] %v1938_v20  ;;  %489 = vperm.xlu1 %1426, %v1874_v7   ;;  %2645 = vst [vmem:[#allocation21_spill] sm:$0xff] %v1964_v28  ;;  %v382_v51 = vmul.f32 %v2052_v10, %v1964_v28  ;;  %v2094_v28 = vrot.slane %v254_v60, %v2074_v49 }
 0x103   : > { %2673 = vst [vmem:[#allocation49_spill] sm:$0xff] %v2094_v28 }
 0x104   : > { %v1941_v21 = vpop.permute.xlu1 %301 }
 0x105   : > { %2638 = vst [vmem:[#allocation14_spill] sm:$0xff] %v1941_v21  ;;  %1428 = vset.pattern.permute.xlu1 %v1629_v19  ;;  %v1969_v30 = vpop.permute.xlu0 %461 }
 0x106   : > { %709 = vperm.xlu1 %1428, %v1861_v3   ;;  %2647 = vst [vmem:[#allocation23_spill] sm:$0xff] %v1969_v30 }
 0x109   : > { %v1944_v22 = vpop.permute.xlu1 %333 }
 0x10a   : > { %2639 = vst [vmem:[#allocation15_spill] sm:$0xff] %v1944_v22  ;;  %717 = vperm.xlu1 %1428, %v1858_v2   ;;  %v1975_v32 = vpop.permute.xlu0 %262  ;;  %v2035_v2 = vsub.s32 2, %v281_v58 }
 0x10b   : > { %2649 = vst [vmem:[#allocation25_spill] sm:$0xff] %v1975_v32 }
 0x10c   : > { %2662 = vst [vmem:[#allocation38_spill] sm:$0xff] %v2035_v2  ;;  %v2048_v8 = vrot.slane %v254_v60, %v2035_v2 }
 0x10e   : > { %1430 = vset.pattern.permute.xlu1 %v1624_v14  ;;  %v1947_v23 = vpop.permute.xlu1 %357  ;;  %v1983_v35 = vpop.permute.xlu0 %272  ;;  %2666 = vst [vmem:[#allocation42_spill] sm:$0xff] %v2048_v8  ;;  %v2059_v14 = vsub.s32 5, %v281_v58 }
 0x10f   : > { %2640 = vst [vmem:[#allocation16_spill] sm:$0xff] %v1947_v23  ;;  %529 = vperm.xlu1 %1430, %v1879_v9   ;;  %2650 = vst [vmem:[#allocation26_spill] sm:$0xff] %v1983_v35  ;;  %v290_v4 = vmul.f32 %v2030_v0, %v1983_v35 }
 0x110   : > { %2668 = vst [vmem:[#allocation44_spill] sm:$0xff] %v2059_v14  ;;  %v2083_v54 = vrot.slane %v254_v60, %v2059_v14 }
 0x112   : > { %v1986_v36 = vpop.permute.xlu0 %267 }
 0x113   : > { %1431 = vset.pattern.permute.xlu1 %v1626_v16  ;;  %v1951_v24 = vpop.permute.xlu1 %389 }
 0x114   : > { %2641 = vst [vmem:[#allocation17_spill] sm:$0xff] %v1951_v24  ;;  %741 = vperm.xlu1 %1431, %v1861_v3  }
 0x117   : > { %v1954_v25 = vpop.permute.xlu1 %397  ;;  %v1994_v39 = vpop.permute.xlu0 %305 }
 0x118   : > { %2642 = vst [vmem:[#allocation18_spill] sm:$0xff] %v1954_v25  ;;  %1434 = vset.pattern.permute.xlu1 %v1621_v11 }
 0x119   : > { %553 = vperm.xlu1 %1434, %v1874_v7  }
 0x11c   : > { %v1958_v26 = vpop.permute.xlu1 %429  ;;  %v2000_v41 = vpop.permute.xlu0 %325 }
 0x11d   : > { %2643 = vst [vmem:[#allocation19_spill] sm:$0xff] %v1958_v26  ;;  %561 = vperm.xlu1 %1434, %v1879_v9   ;;  %2653 = vst [vmem:[#allocation29_spill] sm:$0xff] %v2000_v41  ;;  %v446_v35 = vmul.f32 %v2083_v54, %v1958_v26 }
 0x120   : > { %v2004_v43 = vpop.permute.xlu0 %329 }
 0x121   : > { %1435 = vset.pattern.permute.xlu1 %v1627_v17  ;;  %v1961_v27 = vpop.permute.xlu1 %453  ;;  %v350_v17 = vmul.f32 %v2048_v8, %v1944_v22 }
 0x122   : > { %2644 = vst [vmem:[#allocation20_spill] sm:$0xff] %v1961_v27  ;;  %593 = vperm.xlu1 %1435, %v1879_v9  }
 0x125   : > { %v2008_v45 = vpop.permute.xlu0 %557 }
 0x126   : > { %1436 = vset.pattern.permute.xlu1 %v1628_v18  ;;  %v1966_v29 = vpop.permute.xlu1 %485  ;;  %2655 = vst [vmem:[#allocation31_spill] sm:$0xff] %v2008_v45 }
 0x127   : > { %2646 = vst [vmem:[#allocation22_spill] sm:$0xff] %v1966_v29  ;;  %617 = vperm.xlu1 %1436, %v1874_v7  }
 0x12a   : > { %v1971_v31 = vpop.permute.xlu1 %493  ;;  %v2012_v47 = vpop.permute.xlu0 %401 }
 0x12b   : > { %2648 = vst [vmem:[#allocation24_spill] sm:$0xff] %v1971_v31  ;;  %1438 = vset.pattern.permute.xlu1 %v1623_v13  ;;  %v2057_v13 = vsub.s32 4, %v281_v58 }
 0x12c   : > { %649 = vperm.xlu1 %1438, %v1874_v7  }
 0x12d   : > { %v2069_v18 = vrot.slane %v254_v60, %v2057_v13 }
 0x12f   : > { %v1977_v33 = vpop.permute.xlu1 %277  ;;  %v2018_v57 = vpop.permute.xlu0 %421  ;;  %2669 = vst [vmem:[#allocation45_spill] sm:$0xff] %v2069_v18 }
 0x130   : > { %657 = vperm.xlu1 %1438, %v1879_v9   ;;  %2657 = vst [vmem:[#allocation33_spill] sm:$0xff] %v2018_v57 }
 0x133   : > { %v2023_v61 = vpop.permute.xlu0 %425 }
 0x134   : > { %1440 = vset.pattern.permute.xlu1 %v1625_v15  ;;  %v1981_v34 = vpop.permute.xlu1 %297  ;;  %2659 = vst [vmem:[#allocation35_spill] sm:$0xff] %v2023_v61 }
 0x135   : > { %689 = vperm.xlu1 %1440, %v1879_v9  }
 0x138   : > { %v2043_v6 = vpop.permute.xlu0 %653 }
 0x139   : > { %1441 = vset.pattern.permute.xlu1 %v1629_v19  ;;  %v1988_v37 = vpop.permute.xlu1 %517  ;;  %2665 = vst [vmem:[#allocation41_spill] sm:$0xff] %v2043_v6 }
 0x13a   : > { %2651 = vst [vmem:[#allocation27_spill] sm:$0xff] %v1988_v37  ;;  %713 = vperm.xlu1 %1441, %v1874_v7  }
 0x13d   : > { %v1991_v38 = vpop.permute.xlu1 %525  ;;  %v2076_v50 = vpop.permute.xlu0 %677 }
 0x13e   : > { %2652 = vst [vmem:[#allocation28_spill] sm:$0xff] %v1991_v38  ;;  %1443 = vset.pattern.permute.xlu1 %v1626_v16  ;;  %2671 = vst [vmem:[#allocation47_spill] sm:$0xff] %v2076_v50 }
 0x13f   : > { %745 = vperm.xlu1 %1443, %v1874_v7   ;;  %v318_v7 = vmul.f32 %v2033_v1, %v1941_v21 }
 0x141   : > { %v322_v12 = vadd.f32 %v318_v7, %v290_v4  ;;  %v414_v7 = vmul.f32 %v2069_v18, %v1954_v25 }
 0x142   : > { %v1997_v40 = vpop.permute.xlu1 %337  ;;  %v2104_v10 = vpop.permute.xlu0 %497 }
 0x143   : > { %753 = vperm.xlu1 %1443, %v1879_v9   ;;  %v252_v9 = vld [vmem:[%s1846_s9] sm:$0xff]  ;;  %v354_v53 = vadd.f32 %v350_v17, %v322_v12  ;;  %2674 = vst [vmem:[#allocation50_spill] sm:$0xff] %v2104_v10 }
 0x144   : > { %v2055_v11 = vrot.slane %v252_v9, %v2020_v59  ;;  %v2064_v16 = vrot.slane %v252_v9, %v2027_v63  ;;  %v2072_v19 = vrot.slane %v252_v9, %v2035_v2  ;;  %v2097_v21 = vrot.slane %v252_v9, %v2041_v5 }
 0x145   : > { %v386_v17 = vadd.f32 %v382_v51, %v354_v53  ;;  %v2112_v8 = vrot.slane %v252_v9, %v2057_v13  ;;  %v2115_v51 = vrot.slane %v252_v9, %v2059_v14 }
 0x146   : > { %v288_v52 = vmul.f32 %v2055_v11, %v1975_v32  ;;  %v316_v4 = vmul.f32 %v2064_v16, %v1938_v20  ;;  %v348_v22 = vmul.f32 %v2072_v19, %v2000_v41  ;;  %v2101_v32 = vsub.s32 7, %v281_v58  ;;  %v255_v20 = vld [vmem:[%s1846_s9 + $0x18] sm:$0xff] }
 0x147   : > { %v2002_v42 = vpop.permute.xlu1 %549  ;;  %v418_v25 = vadd.f32 %v414_v7, %v386_v17  ;;  %v478_v58 = vmul.f32 %v2094_v28, %v1969_v30  ;;  %v2131_v17 = vpop.permute.xlu0 %521  ;;  %v412_v30 = vmul.f32 %v2112_v8, %v1951_v24 }
 0x148   : > { %2654 = vst [vmem:[#allocation30_spill] sm:$0xff] %v2002_v42  ;;  %v320_v12 = vadd.f32 %v316_v4, %v288_v52  ;;  %v2107_v41 = vrot.slane %v254_v60, %v2101_v32  ;;  %v380_v52 = vmul.f32 %v2097_v21, %v1947_v23  ;;  %v2143_v23 = vrot.slane %v255_v20, %v2035_v2 }
 0x149   : > { %v450_v53 = vadd.f32 %v446_v35, %v418_v25  ;;  %v444_v25 = vmul.f32 %v2115_v51, %v2018_v57  ;;  %v2151_v57 = vrot.slane %v255_v20, %v2041_v5 }
 0x14a   : > { %v352_v18 = vadd.f32 %v348_v22, %v320_v12  ;;  %2675 = vst [vmem:[#allocation51_spill] sm:$0xff] %v2107_v41  ;;  %v2122_v22 = vrot.slane %v255_v20, %v2020_v59  ;;  %v510_v4 = vmul.f32 %v2107_v41, %v1971_v31  ;;  %v2129_v12 = vrot.slane %v255_v20, %v2027_v63  ;;  %v253_v41 = vld [vmem:[%s1846_s9 + $0x8] sm:$0xff] }
 0x14b   : > { %v482_v26 = vadd.f32 %v478_v58, %v450_v53  ;;  %2678 = vst [vmem:[#allocation54_spill] sm:$0xff] %v2143_v23  ;;  %2680 = vst [vmem:[#allocation56_spill] sm:$0xff] %v2151_v57 }
 0x14c   : > { %v2006_v44 = vpop.permute.xlu1 %361  ;;  %2676 = vst [vmem:[#allocation52_spill] sm:$0xff] %v2122_v22  ;;  %v384_v60 = vadd.f32 %v380_v52, %v352_v18  ;;  %2677 = vst [vmem:[#allocation53_spill] sm:$0xff] %v2129_v12  ;;  %v542_v35 = vmul.f32 %v2122_v22, %v1991_v38  ;;  %v2140_v18 = vrot.slane %v252_v9, %v2074_v49  ;;  %v2153_v38 = vpop.permute.xlu0 %749 }
 0x14d   : > { %v514_v52 = vadd.f32 %v510_v4, %v482_v26  ;;  %v574_v58 = vmul.f32 %v2129_v12, %v2008_v45  ;;  %2681 = vst [vmem:[#allocation57_spill] sm:$0xff] %v2153_v38  ;;  %v2195_v22 = vrot.slane %v255_v20, %v2101_v32 }
 0x14e   : > { %v416_v31 = vadd.f32 %v412_v30, %v384_v60  ;;  %v476_v26 = vmul.f32 %v2140_v18, %v1961_v27  ;;  %v2158_v30 = vrot.slane %v252_v9, %v2101_v32  ;;  %v2161_v60 = vrot.slane %v253_v41, %v2020_v59 }
 0x14f   : > { %v546_v24 = vadd.f32 %v542_v35, %v514_v52  ;;  %v2169_v35 = vrot.slane %v253_v41, %v2027_v63  ;;  %v2176_v9 = vrot.slane %v253_v41, %v2035_v2  ;;  %2684 = vst [vmem:[#allocation60_spill] sm:$0xff] %v2195_v22 }
 0x150   : > { %v2010_v46 = vpop.permute.xlu1 %369  ;;  %v448_v53 = vadd.f32 %v444_v25, %v416_v31  ;;  %v2166_v31 = vrot.slane %v255_v20, %v2057_v13  ;;  %v508_v12 = vmul.f32 %v2158_v30, %v1966_v29 }
 0x151   : > { %v578_v52 = vadd.f32 %v574_v58, %v546_v24  ;;  %v2188_v24 = vrot.slane %v253_v41, %v2041_v5 }
 0x152   : > { %v480_v25 = vadd.f32 %v476_v26, %v448_v53  ;;  %v2183_v53 = vrot.slane %v255_v20, %v2059_v14  ;;  %v2185_v26 = vpop.permute.xlu0 %581 }
 0x153   : > { %2683 = vst [vmem:[#allocation59_spill] sm:$0xff] %v2185_v26  ;;  %v604_v28 = vmul.f32 %v2176_v9, %v2185_v26 }
 0x154   : > { %2682 = vst [vmem:[#allocation58_spill] sm:$0xff] %v2183_v53  ;;  %v512_v58 = vadd.f32 %v508_v12, %v480_v25  ;;  %v2207_v25 = vrot.slane %v255_v20, %v2074_v49 }
 0x155   : > { %v2014_v48 = vpop.permute.xlu1 %589 }
 0x156   : > { %2656 = vst [vmem:[#allocation32_spill] sm:$0xff] %v2014_v48  ;;  %v606_v4 = vmul.f32 %v2143_v23, %v2014_v48  ;;  %v540_v48 = vmul.f32 %v2161_v60, %v1988_v37  ;;  %2686 = vst [vmem:[#allocation62_spill] sm:$0xff] %v2207_v25 }
 0x158   : > { %v610_v23 = vadd.f32 %v606_v4, %v578_v52  ;;  %v2198_v4 = vrot.slane %v253_v41, %v2057_v13  ;;  %v544_v37 = vadd.f32 %v540_v48, %v512_v58  ;;  %v766_v48 = vmul.f32 %v2195_v22, %v2153_v38 }
 0x15a   : > { %v2016_v55 = vpop.permute.xlu1 %393 }
 0x15f   : > { %v2025_v62 = vpop.permute.xlu1 %613 }
 0x160   : > { %2660 = vst [vmem:[#allocation36_spill] sm:$0xff] %v2025_v62 }
 0x163   : > { %v2037_v3 = vpop.permute.xlu1 %621 }
 0x164   : > { %2663 = vst [vmem:[#allocation39_spill] sm:$0xff] %v2037_v3  ;;  %v638_v45 = vmul.f32 %v2151_v57, %v2037_v3  ;;  %v670_v3 = vmul.f32 %v2166_v31, %v2043_v6  ;;  %v572_v57 = vmul.f32 %v2169_v35, %v2002_v42  ;;  %v2212_v42 = vrot.slane %v253_v41, %v2059_v14 }
 0x166   : > { %v642_v29 = vadd.f32 %v638_v45, %v610_v23  ;;  %v576_v6 = vadd.f32 %v572_v57, %v544_v37  ;;  %v636_v23 = vmul.f32 %v2188_v24, %v2025_v62  ;;  %v2223_v57 = vrot.slane %v253_v41, %v2074_v49 }
 0x168   : > { %v2061_v15 = vpop.permute.xlu1 %433  ;;  %v674_v45 = vadd.f32 %v670_v3, %v642_v29  ;;  %v608_v26 = vadd.f32 %v604_v28, %v576_v6  ;;  %v700_v3 = vmul.f32 %v2212_v42, %v2076_v50  ;;  %v2234_v6 = vrot.slane %v253_v41, %v2101_v32 }
 0x16a   : > { %v640_v37 = vadd.f32 %v636_v23, %v608_v26 }
 0x16d   : > { %v2085_v56 = vpop.permute.xlu1 %645 }
 0x16e   : > { %2672 = vst [vmem:[#allocation48_spill] sm:$0xff] %v2085_v56 }
 0x172   : > { %v2109_v61 = vpop.permute.xlu1 %457 }
 0x176   : > { %v2126_v7 = vpop.permute.xlu1 %465 }
 0x17b   : > { %v2146_v10 = vpop.permute.xlu1 %685 }
 0x17c   : > { %2679 = vst [vmem:[#allocation55_spill] sm:$0xff] %v2146_v10  ;;  %v702_v12 = vmul.f32 %v2183_v53, %v2146_v10  ;;  %v668_v10 = vmul.f32 %v2198_v4, %v2085_v56 }
 0x17e   : > { %v706_v53 = vadd.f32 %v702_v12, %v674_v45  ;;  %v672_v62 = vadd.f32 %v668_v10, %v640_v37 }
 0x180   : > { %v2173_v27 = vpop.permute.xlu1 %489  ;;  %v704_v12 = vadd.f32 %v700_v3, %v672_v62 }
 0x185   : > { %v2200_v52 = vpop.permute.xlu1 %709 }
 0x186   : > { %2685 = vst [vmem:[#allocation61_spill] sm:$0xff] %v2200_v52  ;;  %v732_v28 = vmul.f32 %v2223_v57, %v2200_v52  ;;  %v317_v52 = vmul.f32 %v2064_v16, %v1981_v34 }
 0x189   : > { %v2216_v58 = vpop.permute.xlu1 %717 }
 0x18a   : > { %2687 = vst [vmem:[#allocation63_spill] sm:$0xff] %v2216_v58  ;;  %v734_v20 = vmul.f32 %v2207_v25, %v2216_v58  ;;  %v289_v58 = vmul.f32 %v2055_v11, %v1986_v36 }
 0x18c   : > { %v738_v29 = vadd.f32 %v734_v20, %v706_v53 }
 0x18e   : > { %v2227_v38 = vadd.f32 %v766_v48, %v738_v29  ;;  %v2229_v22 = vpop.permute.xlu1 %529  ;;  %v736_v48 = vadd.f32 %v732_v28, %v704_v12 }
 0x190   : > { %2688 = vst [vmem:[#allocation64_spill] sm:$0xff] %v2227_v38  ;;  %v2238_v26 = vrot.slane %v2227_v38, %v2020_v59  ;;  %v2242_v53 = vrot.slane %v2227_v38, %v2027_v63  ;;  %v2250_v45 = vrot.slane %v2227_v38, %v2035_v2  ;;  %v2262_v3 = vrot.slane %v2227_v38, %v2041_v5 }
 0x191   : > { %v2270_v28 = vrot.slane %v2227_v38, %v2057_v13  ;;  %v2284_v16 = vrot.slane %v2227_v38, %v2059_v14 }
 0x192   : > { %v783_v10 = vmul.f32 %v2238_v26, %v1977_v33  ;;  %v795_v23 = vmul.f32 %v2242_v53, %v1994_v39  ;;  %v811_v62 = vmul.f32 %v2250_v45, %v1997_v40  ;;  %v827_v56 = vmul.f32 %v2262_v3, %v2010_v46 }
 0x193   : > { %v2252_v41 = vpop.permute.xlu1 %741 }
 0x194   : > { %2689 = vst [vmem:[#allocation65_spill] sm:$0xff] %v2252_v41  ;;  %v764_v20 = vmul.f32 %v2234_v6, %v2252_v41  ;;  %v799_v37 = vadd.f32 %v795_v23, %v783_v10 }
 0x196   : > { %v2256_v29 = vadd.f32 %v764_v20, %v736_v48  ;;  %v815_v11 = vadd.f32 %v811_v62, %v799_v37  ;;  %v843_v37 = vmul.f32 %v2270_v28, %v2012_v47  ;;  %v2300_v62 = vrot.slane %v2227_v38, %v2074_v49 }
 0x198   : > { %v2272_v12 = vpop.permute.xlu1 %553  ;;  %v775_v10 = vrot.slane %v2256_v29, %v2020_v59  ;;  %v787_v23 = vrot.slane %v2256_v29, %v2027_v63  ;;  %v2280_v48 = vrot.slane %v2256_v29, %v2035_v2  ;;  %v2290_v50 = vrot.slane %v2256_v29, %v2041_v5 }
 0x199   : > { %v349_v2 = vmul.f32 %v2072_v19, %v2004_v43  ;;  %v321_v63 = vadd.f32 %v317_v52, %v289_v58  ;;  %v2308_v59 = vrot.slane %v2256_v29, %v2057_v13  ;;  %v831_v25 = vadd.f32 %v827_v56, %v815_v11 }
 0x19a   : > { %v781_v20 = vmul.f32 %v775_v10, %v1986_v36  ;;  %v793_v41 = vmul.f32 %v787_v23, %v1981_v34  ;;  %v809_v5 = vmul.f32 %v2280_v48, %v2004_v43  ;;  %v319_v19 = vmul.f32 %v2033_v1, %v1994_v39 }
 0x19b   : > { %v381_v52 = vmul.f32 %v2097_v21, %v2006_v44  ;;  %v859_v58 = vmul.f32 %v2284_v16, %v2061_v15  ;;  %v2320_v43 = vrot.slane %v2256_v29, %v2059_v14  ;;  %v291_v56 = vmul.f32 %v2030_v0, %v1977_v33  ;;  %v2690_v33 = vld [vmem:[#allocation42_spill] sm:$0xff] }
 0x19c   : > { %v2302_v36 = vpop.permute.xlu1 %561  ;;  %v797_v34 = vadd.f32 %v793_v41, %v781_v20  ;;  %v825_v41 = vmul.f32 %v2290_v50, %v2006_v44  ;;  %v847_v20 = vadd.f32 %v843_v37, %v831_v25  ;;  %v353_v11 = vadd.f32 %v349_v2, %v321_v63  ;;  %v2691_v2 = vld [vmem:[#allocation35_spill] sm:$0xff] }
 0x19d   : > { %v413_v39 = vmul.f32 %v2112_v8, %v2016_v55  ;;  %v875_v21 = vmul.f32 %v2300_v62, %v2126_v7  ;;  %v2332_v44 = vrot.slane %v2256_v29, %v2074_v49  ;;  %v351_v63 = vmul.f32 %v2690_v33, %v1997_v40  ;;  %v2692_v49 = vld [vmem:[#allocation43_spill] sm:$0xff]  ;;  %v2694_v33 = vld [vmem:[#allocation49_spill] sm:$0xff] }
 0x19e   : > { %v813_v38 = vadd.f32 %v809_v5, %v797_v34  ;;  %v841_v5 = vmul.f32 %v2308_v59, %v2016_v55  ;;  %v863_v34 = vadd.f32 %v859_v58, %v847_v20  ;;  %v385_v25 = vadd.f32 %v381_v52, %v353_v11 }
 0x19f   : > { %v857_v8 = vmul.f32 %v2320_v43, %v2691_v2  ;;  %v383_v58 = vmul.f32 %v2692_v49, %v2010_v46  ;;  %v873_v20 = vmul.f32 %v2332_v44, %v2109_v61  ;;  %v477_v40 = vmul.f32 %v2140_v18, %v2109_v61 }
 0x1a0   : > { %v829_v1 = vadd.f32 %v825_v41, %v813_v38  ;;  %v2340_v14 = vadd.f32 %v875_v21, %v863_v34  ;;  %v445_v38 = vmul.f32 %v2115_v51, %v2691_v2  ;;  %v417_v55 = vadd.f32 %v413_v39, %v385_v25  ;;  %v2696_v2 = vld [vmem:[#allocation13_spill] sm:$0xff] }
 0x1a1   : > { %v2334_v37 = vpop.permute.xlu1 %593  ;;  %v323_v41 = vadd.f32 %v319_v19, %v291_v56  ;;  %v509_v51 = vmul.f32 %v2158_v30, %v2173_v27  ;;  %v2693_v19 = vld [vmem:[#allocation45_spill] sm:$0xff]  ;;  %v447_v39 = vmul.f32 %v2083_v54, %v2061_v15  ;;  %v541_v61 = vmul.f32 %v2161_v60, %v2131_v17  ;;  %v2697_v60 = vld [vmem:[#allocation50_spill] sm:$0xff] }
 0x1a2   : > { %v845_v0 = vadd.f32 %v841_v5, %v829_v1  ;;  %v449_v5 = vadd.f32 %v445_v38, %v417_v55  ;;  %v415_v56 = vmul.f32 %v2693_v19, %v2012_v47  ;;  %v573_v30 = vmul.f32 %v2169_v35, %v2272_v12  ;;  %v2370_v55 = vpop.permute.xlu0 %585  ;;  %v2699_v35 = vld [vmem:[#allocation52_spill] sm:$0xff] }
 0x1a3   : > { %v355_v11 = vadd.f32 %v351_v63, %v323_v41  ;;  %v479_v63 = vmul.f32 %v2694_v33, %v2126_v7  ;;  %v2698_v41 = vld [vmem:[#allocation51_spill] sm:$0xff]  ;;  %v605_v7 = vmul.f32 %v2176_v9, %v2370_v55  ;;  %v2703_v9 = vld [vmem:[#allocation53_spill] sm:$0xff] }
 0x1a4   : > { %v861_v52 = vadd.f32 %v857_v8, %v845_v0  ;;  %v481_v49 = vadd.f32 %v477_v40, %v449_v5  ;;  %v2695_v0 = vld [vmem:[#allocation25_spill] sm:$0xff]  ;;  %v792_v8 = vmul.f32 %v787_v23, %v2696_v2  ;;  %v2700_v23 = vld [vmem:[#allocation26_spill] sm:$0xff] }
 0x1a5   : > { %v387_v46 = vadd.f32 %v383_v58, %v355_v11  ;;  %v780_v47 = vmul.f32 %v775_v10, %v2695_v0  ;;  %v511_v58 = vmul.f32 %v2698_v41, %v2697_v60  ;;  %v543_v10 = vmul.f32 %v2699_v35, %v2229_v22 }
 0x1a6   : > { %v2350_v1 = vpop.permute.xlu1 %617  ;;  %v2352_v21 = vadd.f32 %v873_v20, %v861_v52  ;;  %v513_v18 = vadd.f32 %v509_v51, %v481_v49  ;;  %v2380_v11 = vpop.permute.xlu0 %625  ;;  %v782_v5 = vmul.f32 %v2238_v26, %v2700_v23  ;;  %v2701_v51 = vld [vmem:[#allocation14_spill] sm:$0xff] }
 0x1a7   : > { %v419_v25 = vadd.f32 %v415_v56, %v387_v46  ;;  %v796_v40 = vadd.f32 %v792_v8, %v780_v47  ;;  %v794_v19 = vmul.f32 %v2242_v53, %v2701_v51  ;;  %v637_v56 = vmul.f32 %v2188_v24, %v2350_v1  ;;  %v2702_v46 = vld [vmem:[#allocation29_spill] sm:$0xff]  ;;  %v2704_v53 = vld [vmem:[#allocation54_spill] sm:$0xff] }
 0x1a8   : > { %v545_v15 = vadd.f32 %v541_v61, %v513_v18  ;;  %v808_v49 = vmul.f32 %v2280_v48, %v2702_v46  ;;  %v575_v61 = vmul.f32 %v2703_v9, %v2302_v36  ;;  %v2705_v48 = vld [vmem:[#allocation16_spill] sm:$0xff]  ;;  %v2710_v46 = vld [vmem:[#allocation58_spill] sm:$0xff] }
 0x1a9   : > { %v451_v38 = vadd.f32 %v447_v39, %v419_v25  ;;  %v798_v24 = vadd.f32 %v794_v19, %v782_v5  ;;  %v824_v2 = vmul.f32 %v2290_v50, %v2705_v48  ;;  %v2708_v50 = vld [vmem:[#allocation17_spill] sm:$0xff] }
 0x1aa   : > { %v577_v20 = vadd.f32 %v573_v30, %v545_v15  ;;  %v812_v26 = vadd.f32 %v808_v49, %v796_v40  ;;  %v607_v30 = vmul.f32 %v2704_v53, %v2334_v37  ;;  %v2398_v0 = vpop.permute.xlu0 %681  ;;  %v840_v23 = vmul.f32 %v2308_v59, %v2708_v50  ;;  %v2709_v5 = vld [vmem:[#allocation21_spill] sm:$0xff] }
 0x1ab   : > { %v2362_v34 = vpop.permute.xlu1 %649  ;;  %v483_v52 = vadd.f32 %v479_v63, %v451_v38  ;;  %v2706_v38 = vld [vmem:[#allocation15_spill] sm:$0xff]  ;;  %v883_v59 = vrot.slane %v2256_v29, %v2101_v32  ;;  %v2714_v29 = vld [vmem:[#allocation34_spill] sm:$0xff] }
 0x1ac   : > { %v609_v25 = vadd.f32 %v605_v7, %v577_v20  ;;  %v669_v33 = vmul.f32 %v2198_v4, %v2362_v34  ;;  %v810_v15 = vmul.f32 %v2250_v45, %v2706_v38  ;;  %v701_v4 = vmul.f32 %v2212_v42, %v2398_v0  ;;  %v2707_v7 = vld [vmem:[#allocation56_spill] sm:$0xff] }
 0x1ad   : > { %v515_v39 = vadd.f32 %v511_v58, %v483_v52  ;;  %v828_v52 = vadd.f32 %v824_v2, %v812_v26  ;;  %v639_v40 = vmul.f32 %v2707_v7, %v2380_v11  ;;  %v826_v42 = vmul.f32 %v2262_v3, %v2709_v5  ;;  %v2712_v26 = vld [vmem:[#allocation18_spill] sm:$0xff] }
 0x1ae   : > { %v641_v47 = vadd.f32 %v637_v56, %v609_v25  ;;  %v814_v35 = vadd.f32 %v810_v15, %v798_v24  ;;  %v2711_v25 = vld [vmem:[#allocation33_spill] sm:$0xff] }
 0x1af   : > { %v2372_v54 = vpop.permute.xlu1 %657  ;;  %v547_v63 = vadd.f32 %v543_v10, %v515_v39  ;;  %v844_v19 = vadd.f32 %v840_v23, %v828_v52  ;;  %v856_v3 = vmul.f32 %v2320_v43, %v2711_v25  ;;  %v2715_v15 = vld [vmem:[#allocation37_spill] sm:$0xff] }
 0x1b0   : > { %v673_v41 = vadd.f32 %v669_v33, %v641_v47  ;;  %v671_v45 = vmul.f32 %v2166_v31, %v2372_v54  ;;  %v830_v9 = vadd.f32 %v826_v42, %v814_v35  ;;  %v2713_v47 = vld [vmem:[#allocation62_spill] sm:$0xff] }
 0x1b1   : > { %v579_v8 = vadd.f32 %v575_v61, %v547_v63  ;;  %v2422_v61 = vpop.permute.xlu0 %721  ;;  %v842_v63 = vmul.f32 %v2270_v28, %v2712_v26  ;;  %v2721_v42 = vld [vmem:[#allocation22_spill] sm:$0xff] }
 0x1b2   : > { %v705_v51 = vadd.f32 %v701_v4, %v673_v41  ;;  %v735_v48 = vmul.f32 %v2713_v47, %v2422_v61  ;;  %v2716_v41 = vld [vmem:[#allocation20_spill] sm:$0xff] }
 0x1b3   : > { %v611_v20 = vadd.f32 %v607_v30, %v579_v8  ;;  %v860_v30 = vadd.f32 %v856_v3, %v844_v19  ;;  %v846_v2 = vadd.f32 %v842_v63, %v830_v9  ;;  %v889_v8 = vmul.f32 %v883_v59, %v2173_v27  ;;  %v2717_v4 = vld [vmem:[#allocation64_spill] sm:$0xff]  ;;  %v2719_v27 = vld [vmem:[#allocation38_spill] sm:$0xff] }
 0x1b4   : > { %v2392_v18 = vpop.permute.xlu1 %689  ;;  %v872_v43 = vmul.f32 %v2332_v44, %v2716_v41  ;;  %v887_v52 = vrot.slane %v2717_v4, %v2101_v32  ;;  %v888_v44 = vmul.f32 %v883_v59, %v2721_v42  ;;  %v2730_v42 = vld [vmem:[#allocation36_spill] sm:$0xff] }
 0x1b5   : > { %v643_v56 = vadd.f32 %v639_v40, %v611_v20  ;;  %v703_v49 = vmul.f32 %v2710_v46, %v2392_v18  ;;  %v2718_v20 = vld [vmem:[#allocation19_spill] sm:$0xff]  ;;  %v893_v40 = vadd.f32 %v889_v8, %v2352_v21  ;;  %v2722_v46 = vld [vmem:[#allocation60_spill] sm:$0xff] }
 0x1b6   : > { %v858_v7 = vmul.f32 %v2284_v16, %v2718_v20  ;;  %v876_v50 = vadd.f32 %v872_v43, %v860_v30  ;;  %v2723_v16 = vld [vmem:[#allocation27_spill] sm:$0xff]  ;;  %v891_v26 = vmul.f32 %v887_v52, %v2697_v60  ;;  %v2727_v43 = vld [vmem:[#allocation30_spill] sm:$0xff] }
 0x1b7   : > { %v675_v33 = vadd.f32 %v671_v45, %v643_v56  ;;  %v2720_v45 = vld [vmem:[#allocation40_spill] sm:$0xff]  ;;  %v2728_v20 = vld [vmem:[#allocation46_spill] sm:$0xff] }
 0x1b8   : > { %v895_v8 = vadd.f32 %v891_v26, %v2340_v14 }
 0x1b9   : > { %v2406_v58 = vpop.permute.xlu1 %713  ;;  %v707_v24 = vadd.f32 %v703_v49, %v675_v33  ;;  %v892_v33 = vadd.f32 %v888_v44, %v876_v50  ;;  %v2731_v44 = vld [vmem:[#allocation28_spill] sm:$0xff] }
 0x1ba   : > { %v733_v10 = vmul.f32 %v2223_v57, %v2406_v58 }
 0x1bb   : > { %v739_v23 = vadd.f32 %v735_v48, %v707_v24 }
 0x1bc   : > { %v737_v57 = vadd.f32 %v733_v10, %v705_v51  ;;  %v862_v51 = vadd.f32 %v858_v7, %v846_v2  ;;  %v2725_v2 = vld [vmem:[#allocation44_spill] sm:$0xff]  ;;  %v2729_v7 = vld [vmem:[#allocation59_spill] sm:$0xff] }
 0x1be   : > { %v2420_v39 = vpop.permute.xlu1 %745 }
 0x1bf   : > { %v765_v31 = vmul.f32 %v2234_v6, %v2420_v39 }
 0x1c1   : > { %v769_v53 = vadd.f32 %v765_v31, %v737_v57 }
 0x1c2   : > { %v2441_v28 = vpop.permute.xlu1 %753 }
 0x1c3   : > { %v899_v38 = vrot.slane %v769_v53, %v2714_v29  ;;  %v915_v6 = vrot.slane %v769_v53, %v2715_v15  ;;  %v931_v10 = vrot.slane %v769_v53, %v2719_v27  ;;  %v947_v5 = vrot.slane %v769_v53, %v2720_v45 }
 0x1c4   : > { %v767_v49 = vmul.f32 %v2722_v46, %v2441_v28  ;;  %v963_v21 = vrot.slane %v769_v53, %v2057_v13  ;;  %v2732_v46 = vld [vmem:[#allocation48_spill] sm:$0xff] }
 0x1c5   : > { %v905_v35 = vmul.f32 %v899_v38, %v2131_v17  ;;  %v921_v56 = vmul.f32 %v915_v6, %v2272_v12  ;;  %v904_v9 = vmul.f32 %v899_v38, %v2723_v16  ;;  %v2724_v17 = vld [vmem:[#allocation23_spill] sm:$0xff]  ;;  %v937_v25 = vmul.f32 %v931_v10, %v2370_v55  ;;  %v2726_v55 = vld [vmem:[#allocation24_spill] sm:$0xff] }
 0x1c6   : > { %v874_v57 = vmul.f32 %v2300_v62, %v2724_v17  ;;  %v771_v3 = vadd.f32 %v767_v49, %v739_v23  ;;  %v953_v59 = vmul.f32 %v947_v5, %v2350_v1  ;;  %v969_v48 = vmul.f32 %v963_v21, %v2362_v34 }
 0x1c7   : > { %v909_v19 = vadd.f32 %v905_v35, %v893_v40  ;;  %v908_v47 = vadd.f32 %v904_v9, %v892_v33  ;;  %v979_v62 = vrot.slane %v769_v53, %v2725_v2  ;;  %v890_v38 = vmul.f32 %v887_v52, %v2726_v55  ;;  %v2735_v33 = vld [vmem:[#allocation32_spill] sm:$0xff]  ;;  %v2738_v55 = vld [vmem:[#allocation65_spill] sm:$0xff] }
 0x1c8   : > { %v878_v12 = vadd.f32 %v874_v57, %v862_v51  ;;  %v903_v30 = vrot.slane %v771_v3, %v2714_v29  ;;  %v919_v24 = vrot.slane %v771_v3, %v2715_v15  ;;  %v935_v60 = vrot.slane %v771_v3, %v2719_v27 }
 0x1c9   : > { %v925_v31 = vadd.f32 %v921_v56, %v909_v19  ;;  %v920_v4 = vmul.f32 %v915_v6, %v2727_v43  ;;  %v995_v29 = vrot.slane %v769_v53, %v2728_v20  ;;  %v951_v15 = vrot.slane %v771_v3, %v2720_v45 }
 0x1ca   : > { %v907_v1 = vmul.f32 %v903_v30, %v2229_v22  ;;  %v936_v40 = vmul.f32 %v931_v10, %v2729_v7  ;;  %v894_v34 = vadd.f32 %v890_v38, %v878_v12  ;;  %v923_v14 = vmul.f32 %v919_v24, %v2302_v36  ;;  %v2733_v36 = vld [vmem:[#allocation31_spill] sm:$0xff] }
 0x1cb   : > { %v941_v63 = vadd.f32 %v937_v25, %v925_v31  ;;  %v924_v23 = vadd.f32 %v920_v4, %v908_v47  ;;  %v985_v52 = vmul.f32 %v979_v62, %v2398_v0  ;;  %v1011_v22 = vrot.slane %v769_v53, %v2101_v32  ;;  %v2734_v31 = vld [vmem:[#allocation47_spill] sm:$0xff] }
 0x1cc   : > { %v911_v50 = vadd.f32 %v907_v1, %v895_v8  ;;  %v952_v27 = vmul.f32 %v947_v5, %v2730_v42  ;;  %v906_v6 = vmul.f32 %v903_v30, %v2731_v44  ;;  %v939_v19 = vmul.f32 %v935_v60, %v2334_v37  ;;  %v2739_v1 = vld [vmem:[#allocation41_spill] sm:$0xff] }
 0x1cd   : > { %v957_v41 = vadd.f32 %v953_v59, %v941_v63  ;;  %v967_v45 = vrot.slane %v771_v3, %v2057_v13  ;;  %v940_v10 = vadd.f32 %v936_v40, %v924_v23  ;;  %v968_v49 = vmul.f32 %v963_v21, %v2732_v46  ;;  %v2742_v23 = vld [vmem:[#allocation57_spill] sm:$0xff] }
 0x1ce   : > { %v927_v51 = vadd.f32 %v923_v14, %v911_v50  ;;  %v910_v16 = vadd.f32 %v906_v6, %v894_v34  ;;  %v922_v9 = vmul.f32 %v919_v24, %v2733_v36  ;;  %v955_v0 = vmul.f32 %v951_v15, %v2380_v11  ;;  %v2736_v24 = vld [vmem:[#allocation39_spill] sm:$0xff] }
 0x1cf   : > { %v973_v35 = vadd.f32 %v969_v48, %v957_v41  ;;  %v983_v53 = vrot.slane %v771_v3, %v2725_v2  ;;  %v956_v5 = vadd.f32 %v952_v27, %v940_v10  ;;  %v1001_v57 = vmul.f32 %v995_v29, %v2406_v58  ;;  %v2737_v58 = vld [vmem:[#allocation61_spill] sm:$0xff] }
 0x1d0   : > { %v943_v17 = vadd.f32 %v939_v19, %v927_v51  ;;  %v984_v25 = vmul.f32 %v979_v62, %v2734_v31  ;;  %v926_v37 = vadd.f32 %v922_v9, %v910_v16  ;;  %v938_v13 = vmul.f32 %v935_v60, %v2735_v33 }
 0x1d1   : > { %v989_v56 = vadd.f32 %v985_v52, %v973_v35  ;;  %v971_v26 = vmul.f32 %v967_v45, %v2372_v54  ;;  %v999_v21 = vrot.slane %v771_v3, %v2728_v20  ;;  %v972_v12 = vadd.f32 %v968_v49, %v956_v5  ;;  %v2741_v35 = vld [vmem:[#allocation63_spill] sm:$0xff] }
 0x1d2   : > { %v959_v59 = vadd.f32 %v955_v0, %v943_v17  ;;  %v942_v30 = vadd.f32 %v938_v13, %v926_v37  ;;  %v954_v11 = vmul.f32 %v951_v15, %v2736_v24  ;;  %v987_v48 = vmul.f32 %v983_v53, %v2392_v18  ;;  %v2740_v18 = vld [vmem:[#allocation55_spill] sm:$0xff] }
 0x1d3   : > { %v1005_v63 = vadd.f32 %v1001_v57, %v989_v56  ;;  %v988_v2 = vadd.f32 %v984_v25, %v972_v12  ;;  %v1000_v8 = vmul.f32 %v995_v29, %v2737_v58  ;;  %v1017_v62 = vmul.f32 %v1011_v22, %v2420_v39 }
 0x1d4   : > { %v975_v47 = vadd.f32 %v971_v26, %v959_v59  ;;  %v1016_v38 = vmul.f32 %v1011_v22, %v2738_v55  ;;  %v958_v41 = vadd.f32 %v954_v11, %v942_v30  ;;  %v970_v54 = vmul.f32 %v967_v45, %v2739_v1 }
 0x1d5   : > { %v1003_v43 = vmul.f32 %v999_v21, %v2422_v61  ;;  %v1015_v4 = vrot.slane %v771_v3, %v2101_v32  ;;  %v1004_v20 = vadd.f32 %v1000_v8, %v988_v2  ;;  %v1021_v15 = vadd.f32 %v1017_v62, %v1005_v63 }
 0x1d6   : > { %v991_v60 = vadd.f32 %v987_v48, %v975_v47  ;;  %v974_v7 = vadd.f32 %v970_v54, %v958_v41  ;;  %v986_v40 = vmul.f32 %v983_v53, %v2740_v18  ;;  %v1002_v50 = vmul.f32 %v999_v21, %v2741_v35 }
 0x1d7   : > { %v1020_v34 = vadd.f32 %v1016_v38, %v1004_v20  ;;  %v1019_v14 = vmul.f32 %v1015_v4, %v2441_v28  ;;  %v1018_v32 = vmul.f32 %v1015_v4, %v2742_v23 }
 0x1d8   : > { %v1007_v29 = vadd.f32 %v1003_v43, %v991_v60  ;;  %v990_v39 = vadd.f32 %v986_v40, %v974_v7 }
 0x1d9   : > { %1296 = vmatprep.mubr.msk.f32.mxu0 %vm1024_vm0, %v1020_v34 }
 0x1da   : > { %1297 = vmatmul.mubr.msk.f32.vlgmr.msra.gmra.mrb[0].mxu0 %vm1024_vm0, %v1021_v15  ;;  %v1006_v61 = vadd.f32 %v1002_v50, %v990_v39  ;;  %v1023_v3 = vadd.f32 %v1019_v14, %v1007_v29 }
 0x1dc   : > { %v1022_v52 = vadd.f32 %v1018_v32, %v1006_v61 }
 0x1de   : > { %1299 = vmatprep.mubr.msk.f32.mxu1 %vm1024_vm0, %v1022_v52 }
 0x1df   : > { %1300 = vmatmul.mubr.msk.f32.vlgmr.msra.gmra.mrb[0].mxu1 %vm1024_vm0, %v1023_v3 }
 0x2ad   : > { %v1298_v22 = vpop.f32.mrb[0].mxu0 }
 0x2ae   : > { %1124 = vst.msk [vmem:[%s244_s18 + $0x8] sm:$0xff] %vm1122_vm1, %v1298_v22  ;;  %v1103_v42 = vpop.f32.mrb[1].mxu0 }
 0x2af   : > { %1123 = vst.msk [vmem:[%s244_s18] sm:$0xff] %vm1122_vm1, %v1103_v42 }
 0x2b2   : > { %v1301_v28 = vpop.f32.mrb[0].mxu1 }
 0x2b3   : > { %1126 = vst.msk [vmem:[%s244_s18 + $0x18] sm:$0xff] %vm1122_vm1, %v1301_v28  ;;  %v1113_v27 = vpop.f32.mrb[1].mxu1 }
 0x2b4   : > { %1125 = vst.msk [vmem:[%s244_s18 + $0x10] sm:$0xff] %vm1122_vm1, %v1113_v27 }
 0x2b5   : > { %1546 = shalt.err (!%p1543_p6)
}
 0x2b6   : > { %s1547_s22 = scalar_lea.hbm %s2507_s23, 512  ;;  %s1551_s10 = scalar_lea.hbm %s2553_s3, 2048 }
 0x2b7   : > { %p1548_p8 = scmp.ne.s32.totalorder %s2507_s23, %s1547_s22  ;;  %p1552_p4 = scmp.lt.u32.totalorder %s2507_s23, %s2553_s3 }
 0x2b8   : > { %p1553_p10 = scmp.lt.u32.totalorder %s1551_s10, %s1547_s22  ;;  %p1555_p3 = scmp.lt.u32.totalorder %s1547_s22, %s2507_s23 }
 0x2b9   : > { %p1549_p11 = pnand %p1548_p8, %p1739_p12 }
 0x2ba   : > { %p1554_p13 = por %p1553_p10, %p1552_p4 }
 0x2bb   : > { %p1550_p0 = pneg %p1549_p11 }
 0x2bc   : > { %p1556_p7 = por %p1555_p3, %p1554_p13 }
 0x2be   : > { %p1557_p9 = pnand %p1556_p7, %p1550_p0 }
 0x2c0   : > { %1560 = shalt.err (!%p1557_p9)
}
 0x2c1   : > { %s1631_s20 = smov 128   ;;  %s1632_s7 = smov 8  }
 0x2c2   : > { %1322 = dma.vmem_to_hbm [thread:$0]  (%p1739_p12), %s2502_s6, 512, %s2507_s23, %s1128_s27, %s1631_s20, %s1631_s20, %s1632_s7  }
 0x2c3 PF: > { %p1342_p1 = scmp.ge.s32.totalorder %s1607_s15, 2  ;;  %s1157_s9 = sand.u32 1, %s1595_s12  }
 0x2c4   : > { %p2743_p5 = scmp.ne.s32.totalorder %s2623_s19, 0  ;;  %s1158_s18 = scalar_lea.sflag [#allocation4], %s1157_s9 }
 0x2c6   : > { %p1336_p2 = pnand %p1342_p1, %p2743_p5 }
 0x2c8   : > { %1590 = dma.done.wait (!%p1336_p2), %s1158_s18, 512  }
 0x2c9   : > { %1592 = vsyncadd (!%p1336_p2), %s1158_s18, 4294966784  ;;  %p19_p6 = scmp.ge.s32.totalorder %s1706_s24, 6   ;;  %s2744_s12 = smov %s1599_s13 }
 0x2ca   : > { %s2745_s13 = smov %s1603_s14  ;;  %s2746_s14 = smov %s1735_s17 }
 0x2cb   : > { %s2747_s15 = smov %s1706_s24  ;;  %21 = sbr.rel (!%p19_p6) target bundleno = 10 (0xa), region = 94 }
 0x2d2   :  { %1163 = vsyncpa [#allocation3], 1 }
 0x2d3   :  { %1165 = vsyncpa [#allocation3 + $0x1], 1 }
 0x2d4   :  { %1166 = vsyncpa [#allocation6], 1 }
 0x2d5   :  { %1168 = vsyncpa [#allocation6 + $0x1], 1 }
 0x2d6   :  { %1169 = vsyncpa [#allocation4], 1 }
 0x2d7   :  { %1171 = vsyncpa [#allocation4 + $0x1], 1 }

</bundles_post_ra>
